<compile_context>
chip_gen: v6e
topology: v6e:2x2x1
jax: 0.10.0
libtpu: 0.0.40
codegen_flags: <defaults>
</compile_context>

<pallas_src>
import jax
import jax.numpy as jnp
from jax.experimental import pallas as pl
from jax.experimental.pallas import tpu as pltpu


def lstm_net_kernel(emb_ref, idx_ref, wih_ref, whh_ref, b_ref,
                    wout_ref, bout_ref, out_ref,
                    gx_scr, h_scr, c_scr, rep_scr):
    """Refs:
      emb_ref  : [T*B, E]    bf16, time-major flattened embedded sequence
      idx_ref  : [B, 1]      int32, last valid timestep per sequence
      wih_ref  : [E, 4*Hp]   bf16  (gate blocks i,f,g,o, each padded to Hp)
      whh_ref  : [Hp, 4*Hp]  bf16
      b_ref    : [1, 4*Hp]   f32
      wout_ref : [Hp, Op]    f32
      bout_ref : [1, Op]     f32
      out_ref  : [B, Op]     f32
      gx_scr   : [T*B, 4*Hp] f32   hoisted input-projection gates
      h_scr, c_scr, rep_scr : [B, Hp] f32
    """
    TB, _ = emb_ref.shape
    B, Hp = h_scr.shape
    T = TB // B

    # ---- hoisted input projection: one large MXU matmul, bias folded in ----
    gx_scr[...] = (jnp.dot(emb_ref[...], wih_ref[...],
                           preferred_element_type=jnp.float32)
                   + b_ref[...])                                  # [T*B, 4*Hp]

    # init h0 = c0 = 0, representations = 0
    h_scr[...] = jnp.zeros_like(h_scr)
    c_scr[...] = jnp.zeros_like(c_scr)
    rep_scr[...] = jnp.zeros_like(rep_scr)

    idx = idx_ref[...]                                            # [B, 1] int32

    # ---- fully-unrolled recurrence (T static & small) ----
    for t in range(T):
        gx = gx_scr[pl.ds(t * B, B), :]                           # [B, 4*Hp]
        h_prev = h_scr[...]
        c_prev = c_scr[...]

        # Only the recurrent matmul remains on the serial critical path.
        gates = gx + jnp.dot(h_prev.astype(jnp.bfloat16), whh_ref[...],
                             preferred_element_type=jnp.float32)  # [B, 4*Hp]

        # Lane-aligned (multiple-of-128) gate blocks -> whole-vreg selects.
        i_g = jax.nn.sigmoid(gates[:, 0 * Hp:1 * Hp])
        f_g = jax.nn.sigmoid(gates[:, 1 * Hp:2 * Hp])
        g_g = jnp.tanh(gates[:, 2 * Hp:3 * Hp])
        o_g = jax.nn.sigmoid(gates[:, 3 * Hp:4 * Hp])

        c_new = f_g * c_prev + i_g * g_g
        h_new = o_g * jnp.tanh(c_new)

        c_scr[...] = c_new
        h_scr[...] = h_new

        # Capture the hidden state at the last valid timestep of each sequence.
        rep_scr[...] = jnp.where(idx == t, h_new, rep_scr[...])

    logits = (jnp.dot(rep_scr[...], wout_ref[...],
                      preferred_element_type=jnp.float32) + bout_ref[...])
    out_ref[...] = logits.astype(out_ref.dtype)


def _round_up(x, m):
    return ((x + m - 1) // m) * m


def _pad_gate_cols(w, h, hp):
    """[..., 4*h] -> [..., 4*hp]; zero-pad each gate block, keep i,f,g,o order."""
    lead = w.shape[:-1]
    w4 = w.reshape(lead + (4, h))
    pad = [(0, 0)] * len(lead) + [(0, 0), (0, hp - h)]
    return jnp.pad(w4, pad).reshape(lead + (4 * hp,))


def lstm_net_forward(x_ids, lengths, params):
    """x_ids: [B, T] int32, lengths: [B] int32. Returns logits [B, O]."""
    B, T = x_ids.shape
    emb_table = params["embeddings"]                 # [V, E]
    E = emb_table.shape[1]
    wih, whh, b = params["w_ih"], params["w_hh"], params["b"]
    wout, bout = params["w_out"], params["b_out"]
    H = whh.shape[0]
    O = wout.shape[1]

    Hp = _round_up(H, 128)     # lane-aligned gate blocks / hidden state
    Op = _round_up(O, 128)     # lane-dense output store

    # --- glue: embedding gather + time-major flatten (plain JAX) ---
    # TODO(synk): at realistic B*T*E, fuse this row gather into the kernel via
    # scalar-prefetched token ids (pl.Element index_map) to avoid the extra
    # HBM round-trip of the embedded sequence.
    emb = jnp.take(emb_table, x_ids, axis=0)                       # [B, T, E]
    emb_tm = jnp.transpose(emb, (1, 0, 2)).reshape(T * B, E)       # time-major
    emb_tm = emb_tm.astype(jnp.bfloat16)

    # --- zero-padded weights (padded hidden units provably stay exactly 0) ---
    wih_p = _pad_gate_cols(wih, H, Hp).astype(jnp.bfloat16)              # [E, 4Hp]
    whh_p = jnp.pad(_pad_gate_cols(whh, H, Hp),
                    ((0, Hp - H), (0, 0))).astype(jnp.bfloat16)          # [Hp, 4Hp]
    b_p = _pad_gate_cols(b, H, Hp).astype(jnp.float32)                   # [1, 4Hp]
    wout_p = jnp.pad(wout, ((0, Hp - H), (0, Op - O))).astype(jnp.float32)
    bout_p = jnp.pad(bout, ((0, 0), (0, Op - O))).astype(jnp.float32)

    # Last valid timestep: min(length, T) - 1; `mod T` reproduces PyTorch's
    # negative-index wrap (lstm_out[i, -1]) for lengths == 0.
    idx = jnp.mod(jnp.minimum(lengths.astype(jnp.int32), T) - 1, T)[:, None]

    vmem = pl.BlockSpec(memory_space=pltpu.MemorySpace.VMEM)

    logits_p = pl.pallas_call(
        lstm_net_kernel,
        out_shape=jax.ShapeDtypeStruct((B, Op), jnp.float32),
        in_specs=[vmem] * 7,
        out_specs=vmem,
        scratch_shapes=[
            pltpu.VMEM((T * B, 4 * Hp), jnp.float32),   # hoisted input gates
            pltpu.VMEM((B, Hp), jnp.float32),           # h
            pltpu.VMEM((B, Hp), jnp.float32),           # c
            pltpu.VMEM((B, Hp), jnp.float32),           # representations
        ],
    )(emb_tm, idx, wih_p, whh_p, b_p, wout_p, bout_p)

    return logits_p[:, :O]


def init_params(key, vocab_size, emb_size, hidden_size, output_size):
    ks = jax.random.split(key, 6)
    scale = 0.1
    return {
        "embeddings": scale * jax.random.normal(ks[0], (vocab_size, emb_size), jnp.float32),
        # PyTorch LSTM stores weight_ih [4H, E] / weight_hh [4H, H]; we keep
        # the transposed layouts with the same i,f,g,o gate-block order.
        "w_ih": scale * jax.random.normal(ks[1], (emb_size, 4 * hidden_size), jnp.float32),
        "w_hh": scale * jax.random.normal(ks[2], (hidden_size, 4 * hidden_size), jnp.float32),
        # bias = b_ih + b_hh folded into one vector, broadcast as [1, 4H]
        "b": scale * jax.random.normal(ks[3], (1, 4 * hidden_size), jnp.float32),
        "w_out": scale * jax.random.normal(ks[4], (hidden_size, output_size), jnp.float32),
        "b_out": scale * jax.random.normal(ks[5], (1, output_size), jnp.float32),
    }


if __name__ == "__main__":
    key = jax.random.PRNGKey(0)

    # Small shapes consistent with the module (hidden_size=16 fixed by __init__)
    B, T = 2, 8
    VOCAB, EMB = 20, 32
    HIDDEN = 16
    OUTPUT = 4

    pkey, xkey, lkey = jax.random.split(key, 3)
    params = init_params(pkey, VOCAB, EMB, HIDDEN, OUTPUT)

    x_ids = jax.random.randint(xkey, (B, T), 0, VOCAB, dtype=jnp.int32)
    # include one length > seq_len to exercise the clamping branch
    lengths = jnp.array([5, 12], dtype=jnp.int32)

    logits = lstm_net_forward(x_ids, lengths, params)
    jax.block_until_ready(logits)
    assert logits.shape == (B, OUTPUT)
    assert bool(jnp.all(jnp.isfinite(logits)))
    print("KERNEL_OK")
</pallas_src>

<mosaic_0001>
module attributes {stable_mosaic.version = 11 : i64} {
  func.func @lstm_net_kernel(%arg0: memref<16x32xbf16, #tpu.memory_space<vmem>>, %arg1: memref<2x1xi32, #tpu.memory_space<vmem>>, %arg2: memref<32x512xbf16, #tpu.memory_space<vmem>>, %arg3: memref<128x512xbf16, #tpu.memory_space<vmem>>, %arg4: memref<1x512xf32, #tpu.memory_space<vmem>>, %arg5: memref<128x128xf32, #tpu.memory_space<vmem>>, %arg6: memref<1x128xf32, #tpu.memory_space<vmem>>, %arg7: memref<2x128xf32, #tpu.memory_space<vmem>>, %arg8: memref<16x512xf32, #tpu.memory_space<vmem>>, %arg9: memref<2x128xf32, #tpu.memory_space<vmem>>, %arg10: memref<2x128xf32, #tpu.memory_space<vmem>>, %arg11: memref<2x128xf32, #tpu.memory_space<vmem>>) attributes {dimension_semantics = [], scalar_prefetch = 0 : i64, scratch_operands = 4 : i64, tpu.core_type = #tpu.core_type<tc>} {
    %c0 = arith.constant 0 : index
    %c0_0 = arith.constant 0 : index
    %0 = vector.load %arg0[%c0, %c0_0] : memref<16x32xbf16, #tpu.memory_space<vmem>>, vector<16x32xbf16>
    %c0_1 = arith.constant 0 : index
    %c0_2 = arith.constant 0 : index
    %1 = vector.load %arg2[%c0_1, %c0_2] : memref<32x512xbf16, #tpu.memory_space<vmem>>, vector<32x512xbf16>
    %cst = arith.constant dense<0.000000e+00> : vector<16x512xf32>
    %2 = tpu.matmul %0, %1, %cst {dimension_numbers = #tpu.dot_dimension_numbers<[1], [0], [0], [1], [0, 0, 1, 1], [], []>} : vector<16x32xbf16>, vector<32x512xbf16>, vector<16x512xf32> -> vector<16x512xf32>
    %c0_3 = arith.constant 0 : index
    %c0_4 = arith.constant 0 : index
    %3 = vector.load %arg4[%c0_3, %c0_4] : memref<1x512xf32, #tpu.memory_space<vmem>>, vector<1x512xf32>
    %4 = vector.broadcast %3 : vector<1x512xf32> to vector<16x512xf32>
    %5 = arith.addf %2, %4 : vector<16x512xf32>
    %c0_5 = arith.constant 0 : index
    %c0_6 = arith.constant 0 : index
    %6 = vector.load %arg8[%c0_5, %c0_6] : memref<16x512xf32, #tpu.memory_space<vmem>>, vector<16x512xf32>
    tpu.vector_store %arg8[%c0_5, %c0_6], %5 {strides = array<i32>} : memref<16x512xf32, #tpu.memory_space<vmem>>, vector<16x512xf32>,
    %cst_7 = arith.constant 0.000000e+00 : f32
    %7 = vector.broadcast %cst_7 : f32 to vector<2x128xf32>
    %c0_8 = arith.constant 0 : index
    %c0_9 = arith.constant 0 : index
    %8 = vector.load %arg9[%c0_8, %c0_9] : memref<2x128xf32, #tpu.memory_space<vmem>>, vector<2x128xf32>
    tpu.vector_store %arg9[%c0_8, %c0_9], %7 {strides = array<i32>} : memref<2x128xf32, #tpu.memory_space<vmem>>, vector<2x128xf32>,
    %cst_10 = arith.constant 0.000000e+00 : f32
    %9 = vector.broadcast %cst_10 : f32 to vector<2x128xf32>
    %c0_11 = arith.constant 0 : index
    %c0_12 = arith.constant 0 : index
    %10 = vector.load %arg10[%c0_11, %c0_12] : memref<2x128xf32, #tpu.memory_space<vmem>>, vector<2x128xf32>
    tpu.vector_store %arg10[%c0_11, %c0_12], %9 {strides = array<i32>} : memref<2x128xf32, #tpu.memory_space<vmem>>, vector<2x128xf32>,
    %cst_13 = arith.constant 0.000000e+00 : f32
    %11 = vector.broadcast %cst_13 : f32 to vector<2x128xf32>
    %c0_14 = arith.constant 0 : index
    %c0_15 = arith.constant 0 : index
    %12 = vector.load %arg11[%c0_14, %c0_15] : memref<2x128xf32, #tpu.memory_space<vmem>>, vector<2x128xf32>
    tpu.vector_store %arg11[%c0_14, %c0_15], %11 {strides = array<i32>} : memref<2x128xf32, #tpu.memory_space<vmem>>, vector<2x128xf32>,
    %c0_16 = arith.constant 0 : index
    %c0_17 = arith.constant 0 : index
    %13 = vector.load %arg1[%c0_16, %c0_17] : memref<2x1xi32, #tpu.memory_space<vmem>>, vector<2x1xi32>
    %c0_18 = arith.constant 0 : index
    %c0_19 = arith.constant 0 : index
    %14 = vector.load %arg8[%c0_18, %c0_19] : memref<16x512xf32, #tpu.memory_space<vmem>>, vector<2x512xf32>
    %c0_20 = arith.constant 0 : index
    %c0_21 = arith.constant 0 : index
    %15 = vector.load %arg9[%c0_20, %c0_21] : memref<2x128xf32, #tpu.memory_space<vmem>>, vector<2x128xf32>
    %c0_22 = arith.constant 0 : index
    %c0_23 = arith.constant 0 : index
    %16 = vector.load %arg10[%c0_22, %c0_23] : memref<2x128xf32, #tpu.memory_space<vmem>>, vector<2x128xf32>
    %17 = arith.truncf %15 : vector<2x128xf32> to vector<2x128xbf16>
    %c0_24 = arith.constant 0 : index
    %c0_25 = arith.constant 0 : index
    %18 = vector.load %arg3[%c0_24, %c0_25] : memref<128x512xbf16, #tpu.memory_space<vmem>>, vector<128x512xbf16>
    %cst_26 = arith.constant dense<0.000000e+00> : vector<2x512xf32>
    %19 = tpu.matmul %17, %18, %cst_26 {dimension_numbers = #tpu.dot_dimension_numbers<[1], [0], [0], [1], [0, 0, 1, 1], [], []>} : vector<2x128xbf16>, vector<128x512xbf16>, vector<2x512xf32> -> vector<2x512xf32>
    %20 = arith.addf %14, %19 : vector<2x512xf32>
    %21 = vector.extract_strided_slice %20 {offsets = [0, 0], sizes = [2, 128], strides = [1, 1]} : vector<2x512xf32> to vector<2x128xf32>
    %22 = arith.negf %21 : vector<2x128xf32>
    %23 = math.exp %22 : vector<2x128xf32>
    %cst_27 = arith.constant 1.000000e+00 : f32
    %24 = vector.broadcast %cst_27 : f32 to vector<2x128xf32>
    %25 = arith.addf %24, %23 : vector<2x128xf32>
    %26 = arith.divf %24, %25 : vector<2x128xf32>
    %27 = vector.extract_strided_slice %20 {offsets = [0, 128], sizes = [2, 128], strides = [1, 1]} : vector<2x512xf32> to vector<2x128xf32>
    %28 = arith.negf %27 : vector<2x128xf32>
    %29 = math.exp %28 : vector<2x128xf32>
    %cst_28 = arith.constant 1.000000e+00 : f32
    %30 = vector.broadcast %cst_28 : f32 to vector<2x128xf32>
    %31 = arith.addf %30, %29 : vector<2x128xf32>
    %32 = arith.divf %30, %31 : vector<2x128xf32>
    %33 = vector.extract_strided_slice %20 {offsets = [0, 256], sizes = [2, 128], strides = [1, 1]} : vector<2x512xf32> to vector<2x128xf32>
    %34 = math.tanh %33 : vector<2x128xf32>
    %35 = vector.extract_strided_slice %20 {offsets = [0, 384], sizes = [2, 128], strides = [1, 1]} : vector<2x512xf32> to vector<2x128xf32>
    %36 = arith.negf %35 : vector<2x128xf32>
    %37 = math.exp %36 : vector<2x128xf32>
    %cst_29 = arith.constant 1.000000e+00 : f32
    %38 = vector.broadcast %cst_29 : f32 to vector<2x128xf32>
    %39 = arith.addf %38, %37 : vector<2x128xf32>
    %40 = arith.divf %38, %39 : vector<2x128xf32>
    %41 = arith.mulf %32, %16 : vector<2x128xf32>
    %42 = arith.mulf %26, %34 : vector<2x128xf32>
    %43 = arith.addf %41, %42 : vector<2x128xf32>
    %44 = math.tanh %43 : vector<2x128xf32>
    %45 = arith.mulf %40, %44 : vector<2x128xf32>
    %c0_30 = arith.constant 0 : index
    %c0_31 = arith.constant 0 : index
    %46 = vector.load %arg10[%c0_30, %c0_31] : memref<2x128xf32, #tpu.memory_space<vmem>>, vector<2x128xf32>
    tpu.vector_store %arg10[%c0_30, %c0_31], %43 {strides = array<i32>} : memref<2x128xf32, #tpu.memory_space<vmem>>, vector<2x128xf32>,
    %c0_32 = arith.constant 0 : index
    %c0_33 = arith.constant 0 : index
    %47 = vector.load %arg9[%c0_32, %c0_33] : memref<2x128xf32, #tpu.memory_space<vmem>>, vector<2x128xf32>
    tpu.vector_store %arg9[%c0_32, %c0_33], %45 {strides = array<i32>} : memref<2x128xf32, #tpu.memory_space<vmem>>, vector<2x128xf32>,
    %c0_i32 = arith.constant 0 : i32
    %48 = vector.broadcast %c0_i32 : i32 to vector<2x1xi32>
    %49 = arith.cmpi eq, %13, %48 : vector<2x1xi32>
    %c0_34 = arith.constant 0 : index
    %c0_35 = arith.constant 0 : index
    %50 = vector.load %arg11[%c0_34, %c0_35] : memref<2x128xf32, #tpu.memory_space<vmem>>, vector<2x128xf32>
    %51 = vector.shape_cast %49 : vector<2x1xi1> to vector<2x1xi1>
    %52 = vector.broadcast %51 : vector<2x1xi1> to vector<2x128xi1>
    %53 = arith.select %52, %45, %50 : vector<2x128xi1>, vector<2x128xf32>
    %c0_36 = arith.constant 0 : index
    %c0_37 = arith.constant 0 : index
    %54 = vector.load %arg11[%c0_36, %c0_37] : memref<2x128xf32, #tpu.memory_space<vmem>>, vector<2x128xf32>
    tpu.vector_store %arg11[%c0_36, %c0_37], %53 {strides = array<i32>} : memref<2x128xf32, #tpu.memory_space<vmem>>, vector<2x128xf32>,
    %c2 = arith.constant 2 : index
    %c0_38 = arith.constant 0 : index
    %55 = vector.load %arg8[%c2, %c0_38] : memref<16x512xf32, #tpu.memory_space<vmem>>, vector<2x512xf32>
    %c0_39 = arith.constant 0 : index
    %c0_40 = arith.constant 0 : index
    %56 = vector.load %arg9[%c0_39, %c0_40] : memref<2x128xf32, #tpu.memory_space<vmem>>, vector<2x128xf32>
    %c0_41 = arith.constant 0 : index
    %c0_42 = arith.constant 0 : index
    %57 = vector.load %arg10[%c0_41, %c0_42] : memref<2x128xf32, #tpu.memory_space<vmem>>, vector<2x128xf32>
    %58 = arith.truncf %56 : vector<2x128xf32> to vector<2x128xbf16>
    %c0_43 = arith.constant 0 : index
    %c0_44 = arith.constant 0 : index
    %59 = vector.load %arg3[%c0_43, %c0_44] : memref<128x512xbf16, #tpu.memory_space<vmem>>, vector<128x512xbf16>
    %cst_45 = arith.constant dense<0.000000e+00> : vector<2x512xf32>
    %60 = tpu.matmul %58, %59, %cst_45 {dimension_numbers = #tpu.dot_dimension_numbers<[1], [0], [0], [1], [0, 0, 1, 1], [], []>} : vector<2x128xbf16>, vector<128x512xbf16>, vector<2x512xf32> -> vector<2x512xf32>
    %61 = arith.addf %55, %60 : vector<2x512xf32>
    %62 = vector.extract_strided_slice %61 {offsets = [0, 0], sizes = [2, 128], strides = [1, 1]} : vector<2x512xf32> to vector<2x128xf32>
    %63 = arith.negf %62 : vector<2x128xf32>
    %64 = math.exp %63 : vector<2x128xf32>
    %cst_46 = arith.constant 1.000000e+00 : f32
    %65 = vector.broadcast %cst_46 : f32 to vector<2x128xf32>
    %66 = arith.addf %65, %64 : vector<2x128xf32>
    %67 = arith.divf %65, %66 : vector<2x128xf32>
    %68 = vector.extract_strided_slice %61 {offsets = [0, 128], sizes = [2, 128], strides = [1, 1]} : vector<2x512xf32> to vector<2x128xf32>
    %69 = arith.negf %68 : vector<2x128xf32>
    %70 = math.exp %69 : vector<2x128xf32>
    %cst_47 = arith.constant 1.000000e+00 : f32
    %71 = vector.broadcast %cst_47 : f32 to vector<2x128xf32>
    %72 = arith.addf %71, %70 : vector<2x128xf32>
    %73 = arith.divf %71, %72 : vector<2x128xf32>
    %74 = vector.extract_strided_slice %61 {offsets = [0, 256], sizes = [2, 128], strides = [1, 1]} : vector<2x512xf32> to vector<2x128xf32>
    %75 = math.tanh %74 : vector<2x128xf32>
    %76 = vector.extract_strided_slice %61 {offsets = [0, 384], sizes = [2, 128], strides = [1, 1]} : vector<2x512xf32> to vector<2x128xf32>
    %77 = arith.negf %76 : vector<2x128xf32>
    %78 = math.exp %77 : vector<2x128xf32>
    %cst_48 = arith.constant 1.000000e+00 : f32
    %79 = vector.broadcast %cst_48 : f32 to vector<2x128xf32>
    %80 = arith.addf %79, %78 : vector<2x128xf32>
    %81 = arith.divf %79, %80 : vector<2x128xf32>
    %82 = arith.mulf %73, %57 : vector<2x128xf32>
    %83 = arith.mulf %67, %75 : vector<2x128xf32>
    %84 = arith.addf %82, %83 : vector<2x128xf32>
    %85 = math.tanh %84 : vector<2x128xf32>
    %86 = arith.mulf %81, %85 : vector<2x128xf32>
    %c0_49 = arith.constant 0 : index
    %c0_50 = arith.constant 0 : index
    %87 = vector.load %arg10[%c0_49, %c0_50] : memref<2x128xf32, #tpu.memory_space<vmem>>, vector<2x128xf32>
    tpu.vector_store %arg10[%c0_49, %c0_50], %84 {strides = array<i32>} : memref<2x128xf32, #tpu.memory_space<vmem>>, vector<2x128xf32>,
    %c0_51 = arith.constant 0 : index
    %c0_52 = arith.constant 0 : index
    %88 = vector.load %arg9[%c0_51, %c0_52] : memref<2x128xf32, #tpu.memory_space<vmem>>, vector<2x128xf32>
    tpu.vector_store %arg9[%c0_51, %c0_52], %86 {strides = array<i32>} : memref<2x128xf32, #tpu.memory_space<vmem>>, vector<2x128xf32>,
    %c1_i32 = arith.constant 1 : i32
    %89 = vector.broadcast %c1_i32 : i32 to vector<2x1xi32>
    %90 = arith.cmpi eq, %13, %89 : vector<2x1xi32>
    %c0_53 = arith.constant 0 : index
    %c0_54 = arith.constant 0 : index
    %91 = vector.load %arg11[%c0_53, %c0_54] : memref<2x128xf32, #tpu.memory_space<vmem>>, vector<2x128xf32>
    %92 = vector.shape_cast %90 : vector<2x1xi1> to vector<2x1xi1>
    %93 = vector.broadcast %92 : vector<2x1xi1> to vector<2x128xi1>
    %94 = arith.select %93, %86, %91 : vector<2x128xi1>, vector<2x128xf32>
    %c0_55 = arith.constant 0 : index
    %c0_56 = arith.constant 0 : index
    %95 = vector.load %arg11[%c0_55, %c0_56] : memref<2x128xf32, #tpu.memory_space<vmem>>, vector<2x128xf32>
    tpu.vector_store %arg11[%c0_55, %c0_56], %94 {strides = array<i32>} : memref<2x128xf32, #tpu.memory_space<vmem>>, vector<2x128xf32>,
    %c4 = arith.constant 4 : index
    %c0_57 = arith.constant 0 : index
    %96 = vector.load %arg8[%c4, %c0_57] : memref<16x512xf32, #tpu.memory_space<vmem>>, vector<2x512xf32>
    %c0_58 = arith.constant 0 : index
    %c0_59 = arith.constant 0 : index
    %97 = vector.load %arg9[%c0_58, %c0_59] : memref<2x128xf32, #tpu.memory_space<vmem>>, vector<2x128xf32>
    %c0_60 = arith.constant 0 : index
    %c0_61 = arith.constant 0 : index
    %98 = vector.load %arg10[%c0_60, %c0_61] : memref<2x128xf32, #tpu.memory_space<vmem>>, vector<2x128xf32>
    %99 = arith.truncf %97 : vector<2x128xf32> to vector<2x128xbf16>
    %c0_62 = arith.constant 0 : index
    %c0_63 = arith.constant 0 : index
    %100 = vector.load %arg3[%c0_62, %c0_63] : memref<128x512xbf16, #tpu.memory_space<vmem>>, vector<128x512xbf16>
    %cst_64 = arith.constant dense<0.000000e+00> : vector<2x512xf32>
    %101 = tpu.matmul %99, %100, %cst_64 {dimension_numbers = #tpu.dot_dimension_numbers<[1], [0], [0], [1], [0, 0, 1, 1], [], []>} : vector<2x128xbf16>, vector<128x512xbf16>, vector<2x512xf32> -> vector<2x512xf32>
    %102 = arith.addf %96, %101 : vector<2x512xf32>
    %103 = vector.extract_strided_slice %102 {offsets = [0, 0], sizes = [2, 128], strides = [1, 1]} : vector<2x512xf32> to vector<2x128xf32>
    %104 = arith.negf %103 : vector<2x128xf32>
    %105 = math.exp %104 : vector<2x128xf32>
    %cst_65 = arith.constant 1.000000e+00 : f32
    %106 = vector.broadcast %cst_65 : f32 to vector<2x128xf32>
    %107 = arith.addf %106, %105 : vector<2x128xf32>
    %108 = arith.divf %106, %107 : vector<2x128xf32>
    %109 = vector.extract_strided_slice %102 {offsets = [0, 128], sizes = [2, 128], strides = [1, 1]} : vector<2x512xf32> to vector<2x128xf32>
    %110 = arith.negf %109 : vector<2x128xf32>
    %111 = math.exp %110 : vector<2x128xf32>
    %cst_66 = arith.constant 1.000000e+00 : f32
    %112 = vector.broadcast %cst_66 : f32 to vector<2x128xf32>
    %113 = arith.addf %112, %111 : vector<2x128xf32>
    %114 = arith.divf %112, %113 : vector<2x128xf32>
    %115 = vector.extract_strided_slice %102 {offsets = [0, 256], sizes = [2, 128], strides = [1, 1]} : vector<2x512xf32> to vector<2x128xf32>
    %116 = math.tanh %115 : vector<2x128xf32>
    %117 = vector.extract_strided_slice %102 {offsets = [0, 384], sizes = [2, 128], strides = [1, 1]} : vector<2x512xf32> to vector<2x128xf32>
    %118 = arith.negf %117 : vector<2x128xf32>
    %119 = math.exp %118 : vector<2x128xf32>
    %cst_67 = arith.constant 1.000000e+00 : f32
    %120 = vector.broadcast %cst_67 : f32 to vector<2x128xf32>
    %121 = arith.addf %120, %119 : vector<2x128xf32>
    %122 = arith.divf %120, %121 : vector<2x128xf32>
    %123 = arith.mulf %114, %98 : vector<2x128xf32>
    %124 = arith.mulf %108, %116 : vector<2x128xf32>
    %125 = arith.addf %123, %124 : vector<2x128xf32>
    %126 = math.tanh %125 : vector<2x128xf32>
    %127 = arith.mulf %122, %126 : vector<2x128xf32>
    %c0_68 = arith.constant 0 : index
    %c0_69 = arith.constant 0 : index
    %128 = vector.load %arg10[%c0_68, %c0_69] : memref<2x128xf32, #tpu.memory_space<vmem>>, vector<2x128xf32>
    tpu.vector_store %arg10[%c0_68, %c0_69], %125 {strides = array<i32>} : memref<2x128xf32, #tpu.memory_space<vmem>>, vector<2x128xf32>,
    %c0_70 = arith.constant 0 : index
    %c0_71 = arith.constant 0 : index
    %129 = vector.load %arg9[%c0_70, %c0_71] : memref<2x128xf32, #tpu.memory_space<vmem>>, vector<2x128xf32>
    tpu.vector_store %arg9[%c0_70, %c0_71], %127 {strides = array<i32>} : memref<2x128xf32, #tpu.memory_space<vmem>>, vector<2x128xf32>,
    %c2_i32 = arith.constant 2 : i32
    %130 = vector.broadcast %c2_i32 : i32 to vector<2x1xi32>
    %131 = arith.cmpi eq, %13, %130 : vector<2x1xi32>
    %c0_72 = arith.constant 0 : index
    %c0_73 = arith.constant 0 : index
    %132 = vector.load %arg11[%c0_72, %c0_73] : memref<2x128xf32, #tpu.memory_space<vmem>>, vector<2x128xf32>
    %133 = vector.shape_cast %131 : vector<2x1xi1> to vector<2x1xi1>
    %134 = vector.broadcast %133 : vector<2x1xi1> to vector<2x128xi1>
    %135 = arith.select %134, %127, %132 : vector<2x128xi1>, vector<2x128xf32>
    %c0_74 = arith.constant 0 : index
    %c0_75 = arith.constant 0 : index
    %136 = vector.load %arg11[%c0_74, %c0_75] : memref<2x128xf32, #tpu.memory_space<vmem>>, vector<2x128xf32>
    tpu.vector_store %arg11[%c0_74, %c0_75], %135 {strides = array<i32>} : memref<2x128xf32, #tpu.memory_space<vmem>>, vector<2x128xf32>,
    %c6 = arith.constant 6 : index
    %c0_76 = arith.constant 0 : index
    %137 = vector.load %arg8[%c6, %c0_76] : memref<16x512xf32, #tpu.memory_space<vmem>>, vector<2x512xf32>
    %c0_77 = arith.constant 0 : index
    %c0_78 = arith.constant 0 : index
    %138 = vector.load %arg9[%c0_77, %c0_78] : memref<2x128xf32, #tpu.memory_space<vmem>>, vector<2x128xf32>
    %c0_79 = arith.constant 0 : index
    %c0_80 = arith.constant 0 : index
    %139 = vector.load %arg10[%c0_79, %c0_80] : memref<2x128xf32, #tpu.memory_space<vmem>>, vector<2x128xf32>
    %140 = arith.truncf %138 : vector<2x128xf32> to vector<2x128xbf16>
    %c0_81 = arith.constant 0 : index
    %c0_82 = arith.constant 0 : index
    %141 = vector.load %arg3[%c0_81, %c0_82] : memref<128x512xbf16, #tpu.memory_space<vmem>>, vector<128x512xbf16>
    %cst_83 = arith.constant dense<0.000000e+00> : vector<2x512xf32>
    %142 = tpu.matmul %140, %141, %cst_83 {dimension_numbers = #tpu.dot_dimension_numbers<[1], [0], [0], [1], [0, 0, 1, 1], [], []>} : vector<2x128xbf16>, vector<128x512xbf16>, vector<2x512xf32> -> vector<2x512xf32>
    %143 = arith.addf %137, %142 : vector<2x512xf32>
    %144 = vector.extract_strided_slice %143 {offsets = [0, 0], sizes = [2, 128], strides = [1, 1]} : vector<2x512xf32> to vector<2x128xf32>
    %145 = arith.negf %144 : vector<2x128xf32>
    %146 = math.exp %145 : vector<2x128xf32>
    %cst_84 = arith.constant 1.000000e+00 : f32
    %147 = vector.broadcast %cst_84 : f32 to vector<2x128xf32>
    %148 = arith.addf %147, %146 : vector<2x128xf32>
    %149 = arith.divf %147, %148 : vector<2x128xf32>
    %150 = vector.extract_strided_slice %143 {offsets = [0, 128], sizes = [2, 128], strides = [1, 1]} : vector<2x512xf32> to vector<2x128xf32>
    %151 = arith.negf %150 : vector<2x128xf32>
    %152 = math.exp %151 : vector<2x128xf32>
    %cst_85 = arith.constant 1.000000e+00 : f32
    %153 = vector.broadcast %cst_85 : f32 to vector<2x128xf32>
    %154 = arith.addf %153, %152 : vector<2x128xf32>
    %155 = arith.divf %153, %154 : vector<2x128xf32>
    %156 = vector.extract_strided_slice %143 {offsets = [0, 256], sizes = [2, 128], strides = [1, 1]} : vector<2x512xf32> to vector<2x128xf32>
    %157 = math.tanh %156 : vector<2x128xf32>
    %158 = vector.extract_strided_slice %143 {offsets = [0, 384], sizes = [2, 128], strides = [1, 1]} : vector<2x512xf32> to vector<2x128xf32>
    %159 = arith.negf %158 : vector<2x128xf32>
    %160 = math.exp %159 : vector<2x128xf32>
    %cst_86 = arith.constant 1.000000e+00 : f32
    %161 = vector.broadcast %cst_86 : f32 to vector<2x128xf32>
    %162 = arith.addf %161, %160 : vector<2x128xf32>
    %163 = arith.divf %161, %162 : vector<2x128xf32>
    %164 = arith.mulf %155, %139 : vector<2x128xf32>
    %165 = arith.mulf %149, %157 : vector<2x128xf32>
    %166 = arith.addf %164, %165 : vector<2x128xf32>
    %167 = math.tanh %166 : vector<2x128xf32>
    %168 = arith.mulf %163, %167 : vector<2x128xf32>
    %c0_87 = arith.constant 0 : index
    %c0_88 = arith.constant 0 : index
    %169 = vector.load %arg10[%c0_87, %c0_88] : memref<2x128xf32, #tpu.memory_space<vmem>>, vector<2x128xf32>
    tpu.vector_store %arg10[%c0_87, %c0_88], %166 {strides = array<i32>} : memref<2x128xf32, #tpu.memory_space<vmem>>, vector<2x128xf32>,
    %c0_89 = arith.constant 0 : index
    %c0_90 = arith.constant 0 : index
    %170 = vector.load %arg9[%c0_89, %c0_90] : memref<2x128xf32, #tpu.memory_space<vmem>>, vector<2x128xf32>
    tpu.vector_store %arg9[%c0_89, %c0_90], %168 {strides = array<i32>} : memref<2x128xf32, #tpu.memory_space<vmem>>, vector<2x128xf32>,
    %c3_i32 = arith.constant 3 : i32
    %171 = vector.broadcast %c3_i32 : i32 to vector<2x1xi32>
    %172 = arith.cmpi eq, %13, %171 : vector<2x1xi32>
    %c0_91 = arith.constant 0 : index
    %c0_92 = arith.constant 0 : index
    %173 = vector.load %arg11[%c0_91, %c0_92] : memref<2x128xf32, #tpu.memory_space<vmem>>, vector<2x128xf32>
    %174 = vector.shape_cast %172 : vector<2x1xi1> to vector<2x1xi1>
    %175 = vector.broadcast %174 : vector<2x1xi1> to vector<2x128xi1>
    %176 = arith.select %175, %168, %173 : vector<2x128xi1>, vector<2x128xf32>
    %c0_93 = arith.constant 0 : index
    %c0_94 = arith.constant 0 : index
    %177 = vector.load %arg11[%c0_93, %c0_94] : memref<2x128xf32, #tpu.memory_space<vmem>>, vector<2x128xf32>
    tpu.vector_store %arg11[%c0_93, %c0_94], %176 {strides = array<i32>} : memref<2x128xf32, #tpu.memory_space<vmem>>, vector<2x128xf32>,
    %c8 = arith.constant 8 : index
    %c0_95 = arith.constant 0 : index
    %178 = vector.load %arg8[%c8, %c0_95] : memref<16x512xf32, #tpu.memory_space<vmem>>, vector<2x512xf32>
    %c0_96 = arith.constant 0 : index
    %c0_97 = arith.constant 0 : index
    %179 = vector.load %arg9[%c0_96, %c0_97] : memref<2x128xf32, #tpu.memory_space<vmem>>, vector<2x128xf32>
    %c0_98 = arith.constant 0 : index
    %c0_99 = arith.constant 0 : index
    %180 = vector.load %arg10[%c0_98, %c0_99] : memref<2x128xf32, #tpu.memory_space<vmem>>, vector<2x128xf32>
    %181 = arith.truncf %179 : vector<2x128xf32> to vector<2x128xbf16>
    %c0_100 = arith.constant 0 : index
    %c0_101 = arith.constant 0 : index
    %182 = vector.load %arg3[%c0_100, %c0_101] : memref<128x512xbf16, #tpu.memory_space<vmem>>, vector<128x512xbf16>
    %cst_102 = arith.constant dense<0.000000e+00> : vector<2x512xf32>
    %183 = tpu.matmul %181, %182, %cst_102 {dimension_numbers = #tpu.dot_dimension_numbers<[1], [0], [0], [1], [0, 0, 1, 1], [], []>} : vector<2x128xbf16>, vector<128x512xbf16>, vector<2x512xf32> -> vector<2x512xf32>
    %184 = arith.addf %178, %183 : vector<2x512xf32>
    %185 = vector.extract_strided_slice %184 {offsets = [0, 0], sizes = [2, 128], strides = [1, 1]} : vector<2x512xf32> to vector<2x128xf32>
    %186 = arith.negf %185 : vector<2x128xf32>
    %187 = math.exp %186 : vector<2x128xf32>
    %cst_103 = arith.constant 1.000000e+00 : f32
    %188 = vector.broadcast %cst_103 : f32 to vector<2x128xf32>
    %189 = arith.addf %188, %187 : vector<2x128xf32>
    %190 = arith.divf %188, %189 : vector<2x128xf32>
    %191 = vector.extract_strided_slice %184 {offsets = [0, 128], sizes = [2, 128], strides = [1, 1]} : vector<2x512xf32> to vector<2x128xf32>
    %192 = arith.negf %191 : vector<2x128xf32>
    %193 = math.exp %192 : vector<2x128xf32>
    %cst_104 = arith.constant 1.000000e+00 : f32
    %194 = vector.broadcast %cst_104 : f32 to vector<2x128xf32>
    %195 = arith.addf %194, %193 : vector<2x128xf32>
    %196 = arith.divf %194, %195 : vector<2x128xf32>
    %197 = vector.extract_strided_slice %184 {offsets = [0, 256], sizes = [2, 128], strides = [1, 1]} : vector<2x512xf32> to vector<2x128xf32>
    %198 = math.tanh %197 : vector<2x128xf32>
    %199 = vector.extract_strided_slice %184 {offsets = [0, 384], sizes = [2, 128], strides = [1, 1]} : vector<2x512xf32> to vector<2x128xf32>
    %200 = arith.negf %199 : vector<2x128xf32>
    %201 = math.exp %200 : vector<2x128xf32>
    %cst_105 = arith.constant 1.000000e+00 : f32
    %202 = vector.broadcast %cst_105 : f32 to vector<2x128xf32>
    %203 = arith.addf %202, %201 : vector<2x128xf32>
    %204 = arith.divf %202, %203 : vector<2x128xf32>
    %205 = arith.mulf %196, %180 : vector<2x128xf32>
    %206 = arith.mulf %190, %198 : vector<2x128xf32>
    %207 = arith.addf %205, %206 : vector<2x128xf32>
    %208 = math.tanh %207 : vector<2x128xf32>
    %209 = arith.mulf %204, %208 : vector<2x128xf32>
    %c0_106 = arith.constant 0 : index
    %c0_107 = arith.constant 0 : index
    %210 = vector.load %arg10[%c0_106, %c0_107] : memref<2x128xf32, #tpu.memory_space<vmem>>, vector<2x128xf32>
    tpu.vector_store %arg10[%c0_106, %c0_107], %207 {strides = array<i32>} : memref<2x128xf32, #tpu.memory_space<vmem>>, vector<2x128xf32>,
    %c0_108 = arith.constant 0 : index
    %c0_109 = arith.constant 0 : index
    %211 = vector.load %arg9[%c0_108, %c0_109] : memref<2x128xf32, #tpu.memory_space<vmem>>, vector<2x128xf32>
    tpu.vector_store %arg9[%c0_108, %c0_109], %209 {strides = array<i32>} : memref<2x128xf32, #tpu.memory_space<vmem>>, vector<2x128xf32>,
    %c4_i32 = arith.constant 4 : i32
    %212 = vector.broadcast %c4_i32 : i32 to vector<2x1xi32>
    %213 = arith.cmpi eq, %13, %212 : vector<2x1xi32>
    %c0_110 = arith.constant 0 : index
    %c0_111 = arith.constant 0 : index
    %214 = vector.load %arg11[%c0_110, %c0_111] : memref<2x128xf32, #tpu.memory_space<vmem>>, vector<2x128xf32>
    %215 = vector.shape_cast %213 : vector<2x1xi1> to vector<2x1xi1>
    %216 = vector.broadcast %215 : vector<2x1xi1> to vector<2x128xi1>
    %217 = arith.select %216, %209, %214 : vector<2x128xi1>, vector<2x128xf32>
    %c0_112 = arith.constant 0 : index
    %c0_113 = arith.constant 0 : index
    %218 = vector.load %arg11[%c0_112, %c0_113] : memref<2x128xf32, #tpu.memory_space<vmem>>, vector<2x128xf32>
    tpu.vector_store %arg11[%c0_112, %c0_113], %217 {strides = array<i32>} : memref<2x128xf32, #tpu.memory_space<vmem>>, vector<2x128xf32>,
    %c10 = arith.constant 10 : index
    %c0_114 = arith.constant 0 : index
    %219 = vector.load %arg8[%c10, %c0_114] : memref<16x512xf32, #tpu.memory_space<vmem>>, vector<2x512xf32>
    %c0_115 = arith.constant 0 : index
    %c0_116 = arith.constant 0 : index
    %220 = vector.load %arg9[%c0_115, %c0_116] : memref<2x128xf32, #tpu.memory_space<vmem>>, vector<2x128xf32>
    %c0_117 = arith.constant 0 : index
    %c0_118 = arith.constant 0 : index
    %221 = vector.load %arg10[%c0_117, %c0_118] : memref<2x128xf32, #tpu.memory_space<vmem>>, vector<2x128xf32>
    %222 = arith.truncf %220 : vector<2x128xf32> to vector<2x128xbf16>
    %c0_119 = arith.constant 0 : index
    %c0_120 = arith.constant 0 : index
    %223 = vector.load %arg3[%c0_119, %c0_120] : memref<128x512xbf16, #tpu.memory_space<vmem>>, vector<128x512xbf16>
    %cst_121 = arith.constant dense<0.000000e+00> : vector<2x512xf32>
    %224 = tpu.matmul %222, %223, %cst_121 {dimension_numbers = #tpu.dot_dimension_numbers<[1], [0], [0], [1], [0, 0, 1, 1], [], []>} : vector<2x128xbf16>, vector<128x512xbf16>, vector<2x512xf32> -> vector<2x512xf32>
    %225 = arith.addf %219, %224 : vector<2x512xf32>
    %226 = vector.extract_strided_slice %225 {offsets = [0, 0], sizes = [2, 128], strides = [1, 1]} : vector<2x512xf32> to vector<2x128xf32>
    %227 = arith.negf %226 : vector<2x128xf32>
    %228 = math.exp %227 : vector<2x128xf32>
    %cst_122 = arith.constant 1.000000e+00 : f32
    %229 = vector.broadcast %cst_122 : f32 to vector<2x128xf32>
    %230 = arith.addf %229, %228 : vector<2x128xf32>
    %231 = arith.divf %229, %230 : vector<2x128xf32>
    %232 = vector.extract_strided_slice %225 {offsets = [0, 128], sizes = [2, 128], strides = [1, 1]} : vector<2x512xf32> to vector<2x128xf32>
    %233 = arith.negf %232 : vector<2x128xf32>
    %234 = math.exp %233 : vector<2x128xf32>
    %cst_123 = arith.constant 1.000000e+00 : f32
    %235 = vector.broadcast %cst_123 : f32 to vector<2x128xf32>
    %236 = arith.addf %235, %234 : vector<2x128xf32>
    %237 = arith.divf %235, %236 : vector<2x128xf32>
    %238 = vector.extract_strided_slice %225 {offsets = [0, 256], sizes = [2, 128], strides = [1, 1]} : vector<2x512xf32> to vector<2x128xf32>
    %239 = math.tanh %238 : vector<2x128xf32>
    %240 = vector.extract_strided_slice %225 {offsets = [0, 384], sizes = [2, 128], strides = [1, 1]} : vector<2x512xf32> to vector<2x128xf32>
    %241 = arith.negf %240 : vector<2x128xf32>
    %242 = math.exp %241 : vector<2x128xf32>
    %cst_124 = arith.constant 1.000000e+00 : f32
    %243 = vector.broadcast %cst_124 : f32 to vector<2x128xf32>
    %244 = arith.addf %243, %242 : vector<2x128xf32>
    %245 = arith.divf %243, %244 : vector<2x128xf32>
    %246 = arith.mulf %237, %221 : vector<2x128xf32>
    %247 = arith.mulf %231, %239 : vector<2x128xf32>
    %248 = arith.addf %246, %247 : vector<2x128xf32>
    %249 = math.tanh %248 : vector<2x128xf32>
    %250 = arith.mulf %245, %249 : vector<2x128xf32>
    %c0_125 = arith.constant 0 : index
    %c0_126 = arith.constant 0 : index
    %251 = vector.load %arg10[%c0_125, %c0_126] : memref<2x128xf32, #tpu.memory_space<vmem>>, vector<2x128xf32>
    tpu.vector_store %arg10[%c0_125, %c0_126], %248 {strides = array<i32>} : memref<2x128xf32, #tpu.memory_space<vmem>>, vector<2x128xf32>,
    %c0_127 = arith.constant 0 : index
    %c0_128 = arith.constant 0 : index
    %252 = vector.load %arg9[%c0_127, %c0_128] : memref<2x128xf32, #tpu.memory_space<vmem>>, vector<2x128xf32>
    tpu.vector_store %arg9[%c0_127, %c0_128], %250 {strides = array<i32>} : memref<2x128xf32, #tpu.memory_space<vmem>>, vector<2x128xf32>,
    %c5_i32 = arith.constant 5 : i32
    %253 = vector.broadcast %c5_i32 : i32 to vector<2x1xi32>
    %254 = arith.cmpi eq, %13, %253 : vector<2x1xi32>
    %c0_129 = arith.constant 0 : index
    %c0_130 = arith.constant 0 : index
    %255 = vector.load %arg11[%c0_129, %c0_130] : memref<2x128xf32, #tpu.memory_space<vmem>>, vector<2x128xf32>
    %256 = vector.shape_cast %254 : vector<2x1xi1> to vector<2x1xi1>
    %257 = vector.broadcast %256 : vector<2x1xi1> to vector<2x128xi1>
    %258 = arith.select %257, %250, %255 : vector<2x128xi1>, vector<2x128xf32>
    %c0_131 = arith.constant 0 : index
    %c0_132 = arith.constant 0 : index
    %259 = vector.load %arg11[%c0_131, %c0_132] : memref<2x128xf32, #tpu.memory_space<vmem>>, vector<2x128xf32>
    tpu.vector_store %arg11[%c0_131, %c0_132], %258 {strides = array<i32>} : memref<2x128xf32, #tpu.memory_space<vmem>>, vector<2x128xf32>,
    %c12 = arith.constant 12 : index
    %c0_133 = arith.constant 0 : index
    %260 = vector.load %arg8[%c12, %c0_133] : memref<16x512xf32, #tpu.memory_space<vmem>>, vector<2x512xf32>
    %c0_134 = arith.constant 0 : index
    %c0_135 = arith.constant 0 : index
    %261 = vector.load %arg9[%c0_134, %c0_135] : memref<2x128xf32, #tpu.memory_space<vmem>>, vector<2x128xf32>
    %c0_136 = arith.constant 0 : index
    %c0_137 = arith.constant 0 : index
    %262 = vector.load %arg10[%c0_136, %c0_137] : memref<2x128xf32, #tpu.memory_space<vmem>>, vector<2x128xf32>
    %263 = arith.truncf %261 : vector<2x128xf32> to vector<2x128xbf16>
    %c0_138 = arith.constant 0 : index
    %c0_139 = arith.constant 0 : index
    %264 = vector.load %arg3[%c0_138, %c0_139] : memref<128x512xbf16, #tpu.memory_space<vmem>>, vector<128x512xbf16>
    %cst_140 = arith.constant dense<0.000000e+00> : vector<2x512xf32>
    %265 = tpu.matmul %263, %264, %cst_140 {dimension_numbers = #tpu.dot_dimension_numbers<[1], [0], [0], [1], [0, 0, 1, 1], [], []>} : vector<2x128xbf16>, vector<128x512xbf16>, vector<2x512xf32> -> vector<2x512xf32>
    %266 = arith.addf %260, %265 : vector<2x512xf32>
    %267 = vector.extract_strided_slice %266 {offsets = [0, 0], sizes = [2, 128], strides = [1, 1]} : vector<2x512xf32> to vector<2x128xf32>
    %268 = arith.negf %267 : vector<2x128xf32>
    %269 = math.exp %268 : vector<2x128xf32>
    %cst_141 = arith.constant 1.000000e+00 : f32
    %270 = vector.broadcast %cst_141 : f32 to vector<2x128xf32>
    %271 = arith.addf %270, %269 : vector<2x128xf32>
    %272 = arith.divf %270, %271 : vector<2x128xf32>
    %273 = vector.extract_strided_slice %266 {offsets = [0, 128], sizes = [2, 128], strides = [1, 1]} : vector<2x512xf32> to vector<2x128xf32>
    %274 = arith.negf %273 : vector<2x128xf32>
    %275 = math.exp %274 : vector<2x128xf32>
    %cst_142 = arith.constant 1.000000e+00 : f32
    %276 = vector.broadcast %cst_142 : f32 to vector<2x128xf32>
    %277 = arith.addf %276, %275 : vector<2x128xf32>
    %278 = arith.divf %276, %277 : vector<2x128xf32>
    %279 = vector.extract_strided_slice %266 {offsets = [0, 256], sizes = [2, 128], strides = [1, 1]} : vector<2x512xf32> to vector<2x128xf32>
    %280 = math.tanh %279 : vector<2x128xf32>
    %281 = vector.extract_strided_slice %266 {offsets = [0, 384], sizes = [2, 128], strides = [1, 1]} : vector<2x512xf32> to vector<2x128xf32>
    %282 = arith.negf %281 : vector<2x128xf32>
    %283 = math.exp %282 : vector<2x128xf32>
    %cst_143 = arith.constant 1.000000e+00 : f32
    %284 = vector.broadcast %cst_143 : f32 to vector<2x128xf32>
    %285 = arith.addf %284, %283 : vector<2x128xf32>
    %286 = arith.divf %284, %285 : vector<2x128xf32>
    %287 = arith.mulf %278, %262 : vector<2x128xf32>
    %288 = arith.mulf %272, %280 : vector<2x128xf32>
    %289 = arith.addf %287, %288 : vector<2x128xf32>
    %290 = math.tanh %289 : vector<2x128xf32>
    %291 = arith.mulf %286, %290 : vector<2x128xf32>
    %c0_144 = arith.constant 0 : index
    %c0_145 = arith.constant 0 : index
    %292 = vector.load %arg10[%c0_144, %c0_145] : memref<2x128xf32, #tpu.memory_space<vmem>>, vector<2x128xf32>
    tpu.vector_store %arg10[%c0_144, %c0_145], %289 {strides = array<i32>} : memref<2x128xf32, #tpu.memory_space<vmem>>, vector<2x128xf32>,
    %c0_146 = arith.constant 0 : index
    %c0_147 = arith.constant 0 : index
    %293 = vector.load %arg9[%c0_146, %c0_147] : memref<2x128xf32, #tpu.memory_space<vmem>>, vector<2x128xf32>
    tpu.vector_store %arg9[%c0_146, %c0_147], %291 {strides = array<i32>} : memref<2x128xf32, #tpu.memory_space<vmem>>, vector<2x128xf32>,
    %c6_i32 = arith.constant 6 : i32
    %294 = vector.broadcast %c6_i32 : i32 to vector<2x1xi32>
    %295 = arith.cmpi eq, %13, %294 : vector<2x1xi32>
    %c0_148 = arith.constant 0 : index
    %c0_149 = arith.constant 0 : index
    %296 = vector.load %arg11[%c0_148, %c0_149] : memref<2x128xf32, #tpu.memory_space<vmem>>, vector<2x128xf32>
    %297 = vector.shape_cast %295 : vector<2x1xi1> to vector<2x1xi1>
    %298 = vector.broadcast %297 : vector<2x1xi1> to vector<2x128xi1>
    %299 = arith.select %298, %291, %296 : vector<2x128xi1>, vector<2x128xf32>
    %c0_150 = arith.constant 0 : index
    %c0_151 = arith.constant 0 : index
    %300 = vector.load %arg11[%c0_150, %c0_151] : memref<2x128xf32, #tpu.memory_space<vmem>>, vector<2x128xf32>
    tpu.vector_store %arg11[%c0_150, %c0_151], %299 {strides = array<i32>} : memref<2x128xf32, #tpu.memory_space<vmem>>, vector<2x128xf32>,
    %c14 = arith.constant 14 : index
    %c0_152 = arith.constant 0 : index
    %301 = vector.load %arg8[%c14, %c0_152] : memref<16x512xf32, #tpu.memory_space<vmem>>, vector<2x512xf32>
    %c0_153 = arith.constant 0 : index
    %c0_154 = arith.constant 0 : index
    %302 = vector.load %arg9[%c0_153, %c0_154] : memref<2x128xf32, #tpu.memory_space<vmem>>, vector<2x128xf32>
    %c0_155 = arith.constant 0 : index
    %c0_156 = arith.constant 0 : index
    %303 = vector.load %arg10[%c0_155, %c0_156] : memref<2x128xf32, #tpu.memory_space<vmem>>, vector<2x128xf32>
    %304 = arith.truncf %302 : vector<2x128xf32> to vector<2x128xbf16>
    %c0_157 = arith.constant 0 : index
    %c0_158 = arith.constant 0 : index
    %305 = vector.load %arg3[%c0_157, %c0_158] : memref<128x512xbf16, #tpu.memory_space<vmem>>, vector<128x512xbf16>
    %cst_159 = arith.constant dense<0.000000e+00> : vector<2x512xf32>
    %306 = tpu.matmul %304, %305, %cst_159 {dimension_numbers = #tpu.dot_dimension_numbers<[1], [0], [0], [1], [0, 0, 1, 1], [], []>} : vector<2x128xbf16>, vector<128x512xbf16>, vector<2x512xf32> -> vector<2x512xf32>
    %307 = arith.addf %301, %306 : vector<2x512xf32>
    %308 = vector.extract_strided_slice %307 {offsets = [0, 0], sizes = [2, 128], strides = [1, 1]} : vector<2x512xf32> to vector<2x128xf32>
    %309 = arith.negf %308 : vector<2x128xf32>
    %310 = math.exp %309 : vector<2x128xf32>
    %cst_160 = arith.constant 1.000000e+00 : f32
    %311 = vector.broadcast %cst_160 : f32 to vector<2x128xf32>
    %312 = arith.addf %311, %310 : vector<2x128xf32>
    %313 = arith.divf %311, %312 : vector<2x128xf32>
    %314 = vector.extract_strided_slice %307 {offsets = [0, 128], sizes = [2, 128], strides = [1, 1]} : vector<2x512xf32> to vector<2x128xf32>
    %315 = arith.negf %314 : vector<2x128xf32>
    %316 = math.exp %315 : vector<2x128xf32>
    %cst_161 = arith.constant 1.000000e+00 : f32
    %317 = vector.broadcast %cst_161 : f32 to vector<2x128xf32>
    %318 = arith.addf %317, %316 : vector<2x128xf32>
    %319 = arith.divf %317, %318 : vector<2x128xf32>
    %320 = vector.extract_strided_slice %307 {offsets = [0, 256], sizes = [2, 128], strides = [1, 1]} : vector<2x512xf32> to vector<2x128xf32>
    %321 = math.tanh %320 : vector<2x128xf32>
    %322 = vector.extract_strided_slice %307 {offsets = [0, 384], sizes = [2, 128], strides = [1, 1]} : vector<2x512xf32> to vector<2x128xf32>
    %323 = arith.negf %322 : vector<2x128xf32>
    %324 = math.exp %323 : vector<2x128xf32>
    %cst_162 = arith.constant 1.000000e+00 : f32
    %325 = vector.broadcast %cst_162 : f32 to vector<2x128xf32>
    %326 = arith.addf %325, %324 : vector<2x128xf32>
    %327 = arith.divf %325, %326 : vector<2x128xf32>
    %328 = arith.mulf %319, %303 : vector<2x128xf32>
    %329 = arith.mulf %313, %321 : vector<2x128xf32>
    %330 = arith.addf %328, %329 : vector<2x128xf32>
    %331 = math.tanh %330 : vector<2x128xf32>
    %332 = arith.mulf %327, %331 : vector<2x128xf32>
    %c0_163 = arith.constant 0 : index
    %c0_164 = arith.constant 0 : index
    %333 = vector.load %arg10[%c0_163, %c0_164] : memref<2x128xf32, #tpu.memory_space<vmem>>, vector<2x128xf32>
    tpu.vector_store %arg10[%c0_163, %c0_164], %330 {strides = array<i32>} : memref<2x128xf32, #tpu.memory_space<vmem>>, vector<2x128xf32>,
    %c0_165 = arith.constant 0 : index
    %c0_166 = arith.constant 0 : index
    %334 = vector.load %arg9[%c0_165, %c0_166] : memref<2x128xf32, #tpu.memory_space<vmem>>, vector<2x128xf32>
    tpu.vector_store %arg9[%c0_165, %c0_166], %332 {strides = array<i32>} : memref<2x128xf32, #tpu.memory_space<vmem>>, vector<2x128xf32>,
    %c7_i32 = arith.constant 7 : i32
    %335 = vector.broadcast %c7_i32 : i32 to vector<2x1xi32>
    %336 = arith.cmpi eq, %13, %335 : vector<2x1xi32>
    %c0_167 = arith.constant 0 : index
    %c0_168 = arith.constant 0 : index
    %337 = vector.load %arg11[%c0_167, %c0_168] : memref<2x128xf32, #tpu.memory_space<vmem>>, vector<2x128xf32>
    %338 = vector.shape_cast %336 : vector<2x1xi1> to vector<2x1xi1>
    %339 = vector.broadcast %338 : vector<2x1xi1> to vector<2x128xi1>
    %340 = arith.select %339, %332, %337 : vector<2x128xi1>, vector<2x128xf32>
    %c0_169 = arith.constant 0 : index
    %c0_170 = arith.constant 0 : index
    %341 = vector.load %arg11[%c0_169, %c0_170] : memref<2x128xf32, #tpu.memory_space<vmem>>, vector<2x128xf32>
    tpu.vector_store %arg11[%c0_169, %c0_170], %340 {strides = array<i32>} : memref<2x128xf32, #tpu.memory_space<vmem>>, vector<2x128xf32>,
    %c0_171 = arith.constant 0 : index
    %c0_172 = arith.constant 0 : index
    %342 = vector.load %arg11[%c0_171, %c0_172] : memref<2x128xf32, #tpu.memory_space<vmem>>, vector<2x128xf32>
    %c0_173 = arith.constant 0 : index
    %c0_174 = arith.constant 0 : index
    %343 = vector.load %arg5[%c0_173, %c0_174] : memref<128x128xf32, #tpu.memory_space<vmem>>, vector<128x128xf32>
    %cst_175 = arith.constant dense<0.000000e+00> : vector<2x128xf32>
    %344 = tpu.matmul %342, %343, %cst_175 {dimension_numbers = #tpu.dot_dimension_numbers<[1], [0], [0], [1], [0, 0, 1, 1], [], []>} : vector<2x128xf32>, vector<128x128xf32>, vector<2x128xf32> -> vector<2x128xf32>
    %c0_176 = arith.constant 0 : index
    %c0_177 = arith.constant 0 : index
    %345 = vector.load %arg6[%c0_176, %c0_177] : memref<1x128xf32, #tpu.memory_space<vmem>>, vector<1x128xf32>
    %346 = vector.broadcast %345 : vector<1x128xf32> to vector<2x128xf32>
    %347 = arith.addf %344, %346 : vector<2x128xf32>
    %c0_178 = arith.constant 0 : index
    %c0_179 = arith.constant 0 : index
    %348 = vector.load %arg7[%c0_178, %c0_179] : memref<2x128xf32, #tpu.memory_space<vmem>>, vector<2x128xf32>
    tpu.vector_store %arg7[%c0_178, %c0_179], %347 {strides = array<i32>} : memref<2x128xf32, #tpu.memory_space<vmem>>, vector<2x128xf32>,
    return
  }
}

</mosaic_0001>

<bundles_post_ra>
// kernel: tpu_custom_call.1
= control target key start
LH: loop header
LB: loop body
LE: loop exit
PB: predicated region body
PF: predicated region fallthrough
CT: control target
= control target key end

     0   :  { %12 = vsyncpa [#allocation7], 0  ;;  %s4285_s0 = inlined_call_operand.hbm [shape: bf16[16,32], index: 0, kind: input, shape index: {}]   ;;  %s4286_s1 = inlined_call_operand.vmem [shape: s32[2,1], index: 1, kind: input, shape index: {}]   ;;  %s4287_s2 = inlined_call_operand.hbm [shape: bf16[32,512], index: 2, kind: input, shape index: {}]   ;;  %s4288_s3 = inlined_call_operand.hbm [shape: bf16[128,512], index: 3, kind: input, shape index: {}]   ;;  %s4289_s4 = inlined_call_operand.vmem [shape: f32[1,512], index: 4, kind: input, shape index: {}]   ;;  %s4290_s5 = inlined_call_operand.hbm [shape: f32[128,128], index: 5, kind: input, shape index: {}]   ;;  %s4291_s6 = inlined_call_operand.vmem [shape: f32[1,128], index: 6, kind: input, shape index: {}]   ;;  %s4292_s7 = inlined_call_operand.hbm [shape: f32[2,128], index: 7, kind: output, shape index: {}]  }
   0x1   :  { %13 = vsyncpa [#allocation10], 0 }
   0x2   :  { %14 = vsyncpa [#allocation13], 0 }
   0x3   :  { %15 = vsyncpa [#allocation8], 0  ;;  %s3760_s24 = smov [#allocation9]  }
   0x4   :  { %s35_s25 = sshll.u32 %s3760_s24, 4  ;;  %s36_s25 = int_to_ptr.vmem [resolvable:$true] %s35_s25 }
   0x5   :  { %s3660_s26 = scalar_lea.vmem %s36_s25, 1024  ;;  %p3665_p1 = scmp.lt.s32.totalorder %s36_s25, %s36_s25 }
   0x6   :  { %p3661_p0 = scmp.ne.s32.totalorder %s36_s25, %s3660_s26  ;;  %p3666_p2 = scmp.lt.s32.totalorder %s3660_s26, %s3660_s26 }
   0x8   :  { %p3667_p3 = por %p3666_p2, %p3665_p1 }
   0xa   :  { %p3668_p4 = pnand %p3667_p3, %p3661_p0 }
   0xc   :  { %3671 = shalt.err (!%p3668_p4)
}
   0xd   :  { %s3761_s27 = smov 256   ;;  %s3762_s28 = smov 16  }
   0xe   :  { %41 = dma.hbm_to_vmem [thread:$0]  %s4287_s2, 1024, %s36_s25, [#allocation10], %s3761_s27, %s3761_s27, %s3762_s28  }
   0xf   :  { %s3763_s8 = smov [#allocation6]  }
  0x10   :  { %s21_s9 = sshll.u32 %s3763_s8, 4  ;;  %s22_s9 = int_to_ptr.vmem [resolvable:$true] %s21_s9 }
  0x11   :  { %s3680_s10 = scalar_lea.vmem %s22_s9, 128  ;;  %p3685_p6 = scmp.lt.s32.totalorder %s22_s9, %s22_s9 }
  0x12   :  { %p3681_p5 = scmp.ne.s32.totalorder %s22_s9, %s3680_s10  ;;  %p3686_p7 = scmp.lt.s32.totalorder %s3680_s10, %s3680_s10 }
  0x14   :  { %p3687_p8 = por %p3686_p7, %p3685_p6 }
  0x16   :  { %p3688_p9 = pnand %p3687_p8, %p3681_p5 }
  0x18   :  { %3691 = shalt.err (!%p3688_p9)
}
  0x19   :  { %s3764_s11 = smov 64   ;;  %s3765_s12 = smov 4  }
  0x1a   :  { %27 = dma.hbm_to_vmem [thread:$0]  %s4285_s0, 128, %s22_s9, [#allocation7], %s3764_s11, %s3764_s11, %s3765_s12  }
  0x1b   :  { %s3766_s15 = smov [#allocation11]   ;;  %s3767_s17 = smov [#allocation12]  }
  0x1c   :  { %s47_s16 = sshll.u32 %s3766_s15, 4  ;;  %s61_s2 = sshll.u32 %s3767_s17, 4  ;;  %s48_s16 = int_to_ptr.vmem [resolvable:$true] %s47_s16  ;;  %s62_s2 = int_to_ptr.vmem [resolvable:$true] %s61_s2 }
  0x1d   :  { %s3700_s18 = scalar_lea.vmem %s48_s16, 4096  ;;  %p3705_p11 = scmp.lt.s32.totalorder %s48_s16, %s48_s16 }
  0x1e   :  { %p3701_p10 = scmp.ne.s32.totalorder %s48_s16, %s3700_s18  ;;  %p3706_p12 = scmp.lt.s32.totalorder %s3700_s18, %s3700_s18 }
  0x20   :  { %p3707_p13 = por %p3706_p12, %p3705_p11 }
  0x22   :  { %p3708_p0 = pnand %p3707_p13, %p3701_p10 }
  0x24   :  { %3711 = shalt.err (!%p3708_p0)
}
  0x25   :  { %53 = dma.hbm_to_vmem [thread:$0]  %s4288_s3, 4096, %s48_s16, [#allocation10], %s3761_s27, %s3761_s27, %s3762_s28  }
  0x26   :  { %s3720_s0 = scalar_lea.vmem %s62_s2, 2048  ;;  %p3725_p2 = scmp.lt.s32.totalorder %s62_s2, %s62_s2 }
  0x27   :  { %p3721_p1 = scmp.ne.s32.totalorder %s62_s2, %s3720_s0  ;;  %p3726_p3 = scmp.lt.s32.totalorder %s3720_s0, %s3720_s0 }
  0x29   :  { %p3727_p4 = por %p3726_p3, %p3725_p2 }
  0x2b   :  { %p3728_p5 = pnand %p3727_p4, %p3721_p1 }
  0x2d   :  { %3731 = shalt.err (!%p3728_p5)
}
  0x2e   :  { %s3768_s21 = smov 128   ;;  %s3769_s22 = smov 8  }
  0x2f   :  { %67 = dma.hbm_to_vmem [thread:$0]  %s4290_s5, 2048, %s62_s2, [#allocation13], %s3768_s21, %s3768_s21, %s3769_s22  }
  0x30   :  { %3752 = dma.done.wait [#allocation7], 128  }
  0x31   :  { %3753 = vsyncadd [#allocation7], 4294967168 }
  0x32   :  { %3754 = dma.done.wait [#allocation10], 5120  }
  0x33   :  { %3755 = vsyncadd [#allocation10], 4294962176 }
  0x34   :  { %3756 = dma.done.wait [#allocation13], 2048  }
  0x35   :  { %3757 = vsyncadd [#allocation13], 4294965248  ;;  %v3770_v0 = vmov 0   ;;  %v3771_v1 = vmov 0.0   ;;  %v3402_v2 = vld [vmem:[#allocation9 + $0x24] ss:$16 sps:$4 sm:$0xff]   ;;  %v95_v48 = vlaneseq }
  0x36   :  { %196 = vmatprep.mubr.bf16.mxu1 %v3770_v0  ;;  %493 = vmatprep.mubr.bf16.mxu0 %v3770_v0  ;;  %258 = vst [vmem:[#allocation3] sm:$0x3] %v3771_v1  ;;  %259 = vst [vmem:[#allocation4] sm:$0x3] %v3771_v1  ;;  %v3839_v3 = vld [vmem:[#allocation11 + $0xe4] ss:$16 sps:$4 sm:$0xff]  }
  0x37   :  { %260 = vst [vmem:[#allocation5] sm:$0x3] %v3771_v1  ;;  %3400 = vset.pattern.permute.xlu0 %v3770_v0  ;;  %3401 = vset.pattern.permute.xlu1 %v3770_v0  ;;  %v3406_v4 = vld [vmem:[#allocation9 + $0x20] ss:$16 sps:$4 sm:$0xff]   ;;  %v3408_v6 = vld [vmem:[#allocation9 + $0x4] ss:$16 sps:$4 sm:$0xff]  }
  0x38   :  { %176 = vmatprep.subr.bf16.mxu1 %v3402_v2  ;;  %v3841_v5 = vld [vmem:[#allocation11 + $0xe0] ss:$16 sps:$4 sm:$0xff]   ;;  %461 = vmatprep.subr.bf16.mxu0 %v3839_v3  ;;  %v3845_v7 = vld [vmem:[#allocation11 + $0xc4] ss:$16 sps:$4 sm:$0xff]   ;;  %v3414_v10 = vld [vmem:[#allocation6] sm:$0xff]   ;;  %vm160_vm0 = vcmask 261120  }
  0x39   :  { %177 = vmatpush1.bf16.msra.mxu1 %v3406_v4  ;;  %462 = vmatpush1.bf16.msra.mxu0 %v3841_v5  ;;  %v3412_v8 = vld [vmem:[#allocation9] ss:$16 sps:$4 sm:$0xff]   ;;  %v3415_v11 = vld [vmem:[#allocation9 + $0x28] ss:$16 sps:$4 sm:$0xff]   ;;  %v3417_v12 = vld [vmem:[#allocation9 + $0x2c] ss:$16 sps:$4 sm:$0xff]  }
  0x3a   :  { %178 = vmatprep.subr.bf16.mxu1 %v3408_v6  ;;  %v3847_v9 = vld [vmem:[#allocation11 + $0xc0] ss:$16 sps:$4 sm:$0xff]   ;;  %463 = vmatprep.subr.bf16.mxu0 %v3845_v7  ;;  %v3851_v13 = vld [vmem:[#allocation11 + $0xa4] ss:$16 sps:$4 sm:$0xff]   ;;  %v3423_v15 = vld [vmem:[#allocation9 + $0xc] ss:$16 sps:$4 sm:$0xff]  }
  0x3b   :  { %v3853_v14 = vld [vmem:[#allocation11 + $0xa0] ss:$16 sps:$4 sm:$0xff]   ;;  %v3421_v16 = vld [vmem:[#allocation9 + $0x8] ss:$16 sps:$4 sm:$0xff]   ;;  %v3857_v17 = vld [vmem:[#allocation11 + $0x84] ss:$16 sps:$4 sm:$0xff]  }
  0x3c   :  { %v3860_v18 = vld [vmem:[#allocation11 + $0x80] ss:$16 sps:$4 sm:$0xff]   ;;  %v3863_v19 = vld [vmem:[#allocation11 + $0x64] ss:$16 sps:$4 sm:$0xff]   ;;  %v3865_v20 = vld [vmem:[#allocation11 + $0xec] ss:$16 sps:$4 sm:$0xff]  }
  0x3d   :  { %179 = vmatpush1.bf16.msra.mxu1 %v3412_v8  ;;  %464 = vmatpush1.bf16.msra.mxu0 %v3847_v9  ;;  %v3869_v21 = vld [vmem:[#allocation11 + $0xe8] ss:$16 sps:$4 sm:$0xff]   ;;  %v3871_v22 = vld [vmem:[#allocation11 + $0x60] ss:$16 sps:$4 sm:$0xff]   ;;  %v3873_v23 = vld [vmem:[#allocation11 + $0x44] ss:$16 sps:$4 sm:$0xff]  }
  0x3e   :  { %219 = vmatprep.subr.bf16.mxu1 %v3417_v12  ;;  %465 = vmatprep.subr.bf16.mxu0 %v3851_v13  ;;  %v3877_v24 = vld [vmem:[#allocation11 + $0xcc] ss:$16 sps:$4 sm:$0xff]   ;;  %v3880_v25 = vld [vmem:[#allocation11 + $0xc8] ss:$16 sps:$4 sm:$0xff]   ;;  %v3884_v26 = vld [vmem:[#allocation11 + $0x40] ss:$16 sps:$4 sm:$0xff]  }
  0x3f   :  { %v3888_v27 = vld [vmem:[#allocation11 + $0x24] ss:$16 sps:$4 sm:$0xff]   ;;  %v3890_v28 = vld [vmem:[#allocation11 + $0xac] ss:$16 sps:$4 sm:$0xff]   ;;  %v3893_v29 = vld [vmem:[#allocation11 + $0xa8] ss:$16 sps:$4 sm:$0xff]  }
  0x40   :  { %3051 = vmatmul.mubr.msk.bf16.vlgmr.msra.gmra.mxu1 %vm160_vm0, %v3414_v10  ;;  %v3895_v30 = vld [vmem:[#allocation11 + $0x20] ss:$16 sps:$4 sm:$0xff]   ;;  %v3899_v31 = vld [vmem:[#allocation11 + $0x4] ss:$16 sps:$4 sm:$0xff]   ;;  %v3903_v32 = vld [vmem:[#allocation11 + $0x8c] ss:$16 sps:$4 sm:$0xff]  }
  0x41   :  { %220 = vmatpush1.bf16.msra.mxu1 %v3415_v11  ;;  %466 = vmatpush1.bf16.msra.mxu0 %v3853_v14  ;;  %v3905_v33 = vld [vmem:[#allocation11 + $0x88] ss:$16 sps:$4 sm:$0xff]   ;;  %v3907_v34 = vld [vmem:[#allocation11] ss:$16 sps:$4 sm:$0xff]   ;;  %v3911_v36 = vld [vmem:[#allocation11 + $0x6c] ss:$16 sps:$4 sm:$0xff]  }
  0x42   :  { %221 = vmatprep.subr.bf16.mxu1 %v3423_v15  ;;  %467 = vmatprep.subr.bf16.mxu0 %v3857_v17  ;;  %v266_v35 = vld [vmem:[#allocation3] sm:$0x3]  ;;  %v3921_v38 = vld [vmem:[#allocation11 + $0x68] ss:$16 sps:$4 sm:$0xff]   ;;  %v3924_v41 = vld [vmem:[#allocation11 + $0x4c] ss:$16 sps:$4 sm:$0xff]  }
  0x43   :  { %239 = vmatprep.mubr.bf16.mxu1 %v3770_v0  ;;  %v3916_v37 = vld [vmem:[%s4286_s1] sm:$0x3]  ;;  %v268_v40 = vpack.c.bf16 %v266_v35, %v266_v35  ;;  %v3930_v42 = vld [vmem:[#allocation11 + $0x48] ss:$16 sps:$4 sm:$0xff]   ;;  %v3932_v43 = vld [vmem:[#allocation11 + $0x2c] ss:$16 sps:$4 sm:$0xff]  }
  0x44   :  { %vm573_vm1 = vcmp.eq.s32.totalorder %v3916_v37, 0  ;;  %v3938_v44 = vld [vmem:[#allocation11 + $0x28] ss:$16 sps:$4 sm:$0xff]   ;;  %v3941_v45 = vld [vmem:[#allocation11 + $0xc] ss:$16 sps:$4 sm:$0xff]   ;;  %vm908_vm2 = vcmp.eq.s32.totalorder %v3916_v37, 1 }
  0x45   :  { %222 = vmatpush1.bf16.msra.mxu1 %v3421_v16  ;;  %468 = vmatpush1.bf16.msra.mxu0 %v3860_v18  ;;  %v575_v39 = vsel %vm573_vm1, 1, %v3770_v0  ;;  %v3948_v46 = vld [vmem:[#allocation11 + $0x8] ss:$16 sps:$4 sm:$0xff]   ;;  %v910_v47 = vsel %vm908_vm2, 1, %v3770_v0  ;;  %v96_v49 = vshrl.u32 %v95_v48, 7  ;;  %vm1246_vm4 = vcmp.eq.s32.totalorder %v3916_v37, 2 }
  0x46   :  { %469 = vmatprep.subr.bf16.mxu0 %v3863_v19  ;;  %502 = vmatprep.subr.bf16.mxu1 %v3865_v20  ;;  %v93_v51 = vld [vmem:[%s4289_s4] sm:$0xf]  ;;  %vm1584_vm6 = vcmp.eq.s32.totalorder %v3916_v37, 3  ;;  %vm1907_vm8 = vcmp.eq.s32.totalorder %v3916_v37, 4  ;;  %s3773_s29 = smov [#allocation14]  }
  0x47   :  { %577 = vperm.xlu0 %3400, %v575_v39   ;;  %v97_v50 = vsub.s32 0, %v96_v49  ;;  %v101_v52 = vsub.s32 1, %v96_v49  ;;  %v105_v57 = vsub.s32 2, %v96_v49  ;;  %v109_v60 = vsub.s32 3, %v96_v49  ;;  %s3031_s30 = sshll.u32 %s3773_s29, 4  ;;  %s3032_s30 = int_to_ptr.vmem [resolvable:$true] %s3031_s30 }
  0x48   :  { %3052 = vmatmul.mubr.msk.bf16.vlgmr.msra.gmra.mxu1 %vm160_vm0, %v3414_v10  ;;  %vm3772_vm0 = vmmov 0   ;;  %s3732_s8 = scalar_lea.vmem %s3032_s30, 32  ;;  %p3737_p7 = scmp.lt.s32.totalorder %s3032_s30, %s3032_s30 }
  0x49   :  { %470 = vmatpush1.bf16.msra.mxu0 %v3871_v22  ;;  %503 = vmatpush1.bf16.msra.mxu1 %v3869_v21  ;;  %v98_v53 = vrot.slane %v93_v51, %v97_v50  ;;  %v102_v54 = vrot.slane %v93_v51, %v101_v52  ;;  %v106_v63 = vrot.slane %v93_v51, %v105_v57  ;;  %p3733_p6 = scmp.ne.s32.totalorder %s3032_s30, %s3732_s8  ;;  %p3738_p8 = scmp.lt.s32.totalorder %s3732_s8, %s3732_s8 }
  0x4a   :  { %471 = vmatprep.subr.bf16.mxu0 %v3873_v23  ;;  %504 = vmatprep.subr.bf16.mxu1 %v3877_v24  ;;  %v110_v4 = vrot.slane %v93_v51, %v109_v60 }
  0x4b   :  { %534 = vmatprep.mubr.bf16.mxu1 %v3770_v0  ;;  %912 = vperm.xlu0 %3400, %v910_v47   ;;  %p3739_p9 = por %p3738_p8, %p3737_p7 }
  0x4d   :  { %472 = vmatpush1.bf16.msra.mxu0 %v3884_v26  ;;  %505 = vmatpush1.bf16.msra.mxu1 %v3880_v25  ;;  %p3740_p10 = pnand %p3739_p9, %p3733_p6 }
  0x4e   :  { %473 = vmatprep.subr.bf16.mxu0 %v3888_v27  ;;  %506 = vmatprep.subr.bf16.mxu1 %v3890_v28 }
  0x51   :  { %474 = vmatpush1.bf16.msra.mxu0 %v3895_v30  ;;  %507 = vmatpush1.bf16.msra.mxu1 %v3893_v29 }
  0x52   :  { %475 = vmatprep.subr.bf16.mxu0 %v3899_v31  ;;  %508 = vmatprep.subr.bf16.mxu1 %v3903_v32 }
  0x55   :  { %476 = vmatpush1.bf16.msra.mxu0 %v3907_v34  ;;  %509 = vmatpush1.bf16.msra.mxu1 %v3905_v33 }
  0x56   :  { %510 = vmatprep.subr.bf16.mxu1 %v3911_v36  ;;  %781 = vmatprep.subr.bf16.mxu0 %v3839_v3 }
  0x58   :  { %494 = vmatmul.mubr.bf16.vlgmr.msra.gmra.mxu0 %v268_v40 }
  0x59   :  { %511 = vmatpush1.bf16.msra.mxu1 %v3921_v38  ;;  %782 = vmatpush1.bf16.msra.mxu0 %v3841_v5 }
  0x5a   :  { %512 = vmatprep.subr.bf16.mxu1 %v3924_v41  ;;  %783 = vmatprep.subr.bf16.mxu0 %v3845_v7 }
  0x5b   :  { %813 = vmatprep.mubr.bf16.mxu0 %v3770_v0 }
  0x5d   :  { %513 = vmatpush1.bf16.msra.mxu1 %v3930_v42  ;;  %784 = vmatpush1.bf16.msra.mxu0 %v3847_v9 }
  0x5e   :  { %514 = vmatprep.subr.bf16.mxu1 %v3932_v43  ;;  %785 = vmatprep.subr.bf16.mxu0 %v3851_v13 }
  0x61   :  { %515 = vmatpush1.bf16.msra.mxu1 %v3938_v44  ;;  %786 = vmatpush1.bf16.msra.mxu0 %v3853_v14 }
  0x62   :  { %516 = vmatprep.subr.bf16.mxu1 %v3941_v45  ;;  %787 = vmatprep.subr.bf16.mxu0 %v3857_v17 }
  0x65   :  { %517 = vmatpush1.bf16.msra.mxu1 %v3948_v46  ;;  %788 = vmatpush1.bf16.msra.mxu0 %v3860_v18 }
  0x66   :  { %822 = vmatprep.subr.bf16.mxu1 %v3865_v20  ;;  %789 = vmatprep.subr.bf16.mxu0 %v3863_v19 }
  0x68   :  { %535 = vmatmul.mubr.bf16.vlgmr.msra.gmra.mxu1 %v268_v40 }
  0x69   :  { %823 = vmatpush1.bf16.msra.mxu1 %v3869_v21  ;;  %790 = vmatpush1.bf16.msra.mxu0 %v3871_v22 }
  0x6a   :  { %824 = vmatprep.subr.bf16.mxu1 %v3877_v24  ;;  %791 = vmatprep.subr.bf16.mxu0 %v3873_v23 }
  0x6b   :  { %854 = vmatprep.mubr.bf16.mxu1 %v3770_v0 }
  0x6d   :  { %825 = vmatpush1.bf16.msra.mxu1 %v3880_v25  ;;  %792 = vmatpush1.bf16.msra.mxu0 %v3884_v26 }
  0x6e   :  { %826 = vmatprep.subr.bf16.mxu1 %v3890_v28  ;;  %793 = vmatprep.subr.bf16.mxu0 %v3888_v27 }
  0x71   :  { %827 = vmatpush1.bf16.msra.mxu1 %v3893_v29  ;;  %794 = vmatpush1.bf16.msra.mxu0 %v3895_v30 }
  0x72   :  { %828 = vmatprep.subr.bf16.mxu1 %v3903_v32  ;;  %795 = vmatprep.subr.bf16.mxu0 %v3899_v31 }
  0x75   :  { %829 = vmatpush1.bf16.msra.mxu1 %v3905_v33  ;;  %796 = vmatpush1.bf16.msra.mxu0 %v3907_v34 }
  0x76   :  { %830 = vmatprep.subr.bf16.mxu1 %v3911_v36  ;;  %1119 = vmatprep.subr.bf16.mxu0 %v3839_v3 }
  0x79   :  { %831 = vmatpush1.bf16.msra.mxu1 %v3921_v38 }
  0x7a   :  { %832 = vmatprep.subr.bf16.mxu1 %v3924_v41 }
  0x7d   :  { %833 = vmatpush1.bf16.msra.mxu1 %v3930_v42 }
  0x7e   :  { %834 = vmatprep.subr.bf16.mxu1 %v3932_v43 }
  0x81   :  { %835 = vmatpush1.bf16.msra.mxu1 %v3938_v44 }
  0x82   :  { %836 = vmatprep.subr.bf16.mxu1 %v3941_v45 }
  0x85   :  { %837 = vmatpush1.bf16.msra.mxu1 %v3948_v46 }
  0x86   :  { %1160 = vmatprep.subr.bf16.mxu1 %v3865_v20 }
 0x100   :  { %v198_v55 = vpop.f32.mrf.mxu1 }
 0x101   :  { %v199_v56 = vadd.f32 %v198_v55, %v98_v53 }
 0x102   :  { %v200_v58 = vpop.f32.mrf.mxu1 }
 0x103   :  { %250 = vst [vmem:[#allocation2 + $0x30] sm:$0xff] %v199_v56  ;;  %v201_v59 = vadd.f32 %v200_v58, %v102_v54 }
 0x104   :  { %v202_v61 = vpop.f32.mrf.mxu1 }
 0x105   :  { %251 = vst [vmem:[#allocation2] sm:$0xff] %v201_v59  ;;  %v203_v62 = vadd.f32 %v202_v61, %v98_v53 }
 0x106   :  { %v204_v2 = vpop.f32.mrf.mxu1 }
 0x107   :  { %254 = vst [vmem:[#allocation2 + $0x8] sm:$0xff] %v203_v62  ;;  %v205_v3 = vadd.f32 %v204_v2, %v102_v54 }
 0x108   :  { %v241_v6 = vpop.f32.mrf.mxu1 }
 0x109   :  { %255 = vst [vmem:[#allocation2 + $0x20] sm:$0xff] %v205_v3  ;;  %v242_v8 = vadd.f32 %v241_v6, %v106_v63 }
 0x10a   :  { %v243_v10 = vpop.f32.mrf.mxu1  ;;  %v262_v39 = vld [vmem:[#allocation2 + $0x30] sm:$0x3] }
 0x10b   :  { %252 = vst [vmem:[#allocation2 + $0x18] sm:$0xff] %v242_v8  ;;  %v244_v11 = vadd.f32 %v243_v10, %v110_v4  ;;  %v267_v10 = vld [vmem:[#allocation4] sm:$0x3] }
 0x10c   :  { %v245_v12 = vpop.f32.mrf.mxu1  ;;  %v263_v48 = vld [vmem:[#allocation2] sm:$0x3] }
 0x10d   :  { %253 = vst [vmem:[#allocation2 + $0x10] sm:$0xff] %v244_v11  ;;  %v246_v15 = vadd.f32 %v245_v12, %v106_v63 }
 0x10e   :  { %v247_v16 = vpop.f32.mrf.mxu1 }
 0x10f   :  { %256 = vst [vmem:[#allocation2 + $0x28] sm:$0xff] %v246_v15  ;;  %v248_v35 = vadd.f32 %v247_v16, %v110_v4 }
 0x111   :  { %257 = vst [vmem:[#allocation2 + $0x38] sm:$0xff] %v248_v35 }
 0x112   :  { %v264_v56 = vld [vmem:[#allocation2 + $0x18] sm:$0x3] }
 0x114   :  { %v265_v59 = vld [vmem:[#allocation2 + $0x10] sm:$0x3] }
 0x118   :  { %v495_v40 = vpop.f32.mrf.mxu0 }
 0x119   :  { %v543_v47 = vadd.f32 %v495_v40, %v262_v39 }
 0x11a   :  { %v497_v49 = vpop.f32.mrf.mxu0 }
 0x11b   :  { %v3085_v50 = vmul.f32 -1.442695, %v543_v47  ;;  %v544_v51 = vadd.f32 %v497_v49, %v263_v48  ;;  %v578_v47 = vpop.permute.xlu0 %577 }
 0x11c   :  { %v499_v52 = vpop.f32.mrf.mxu0  ;;  %vm579_vm3 = vcmp.eq.s32.totalorder %v578_v47, 1 }
 0x11d   :  { %3523 = vpow2.f32 %v3085_v50  ;;  %v3086_v53 = vmul.f32 -1.442695, %v544_v51  ;;  %v574_v50 = vld [vmem:[#allocation5] sm:$0x3] }
 0x11e   :  { %v500_v54 = vpop.f32.mrf.mxu0 }
 0x11f   :  { %3525 = vpow2.f32 %v3086_v53 }
 0x128   :  { %v536_v55 = vpop.f32.mrf.mxu1 }
 0x129   :  { %v545_v58 = vadd.f32 %v536_v55, %v264_v56 }
 0x12a   :  { %v3524_v57 = vpop.eup %3523  ;;  %v538_v60 = vpop.f32.mrf.mxu1 }
 0x12b   :  { %v550_v61 = vadd.f32 1.0, %v3524_v57  ;;  %v546_v62 = vadd.f32 %v538_v60, %v265_v59 }
 0x12c   :  { %v3526_v63 = vpop.eup %3525  ;;  %v540_v2 = vpop.f32.mrf.mxu1 }
 0x12d   :  { %3527 = vrcp.f32 %v550_v61  ;;  %v556_v3 = vadd.f32 1.0, %v3526_v63  ;;  %v3087_v4 = vmul.f32 -1.442695, %v546_v62 }
 0x12e   :  { %3529 = vtanh.f32 %v545_v58  ;;  %v541_v6 = vpop.f32.mrf.mxu1  ;;  %v583_v58 = vld [vmem:[#allocation2] sm:$0xc] }
 0x12f   :  { %3531 = vrcp.f32 %v556_v3  ;;  %v585_v3 = vld [vmem:[#allocation2 + $0x10] sm:$0xc] }
 0x130   :  { %3533 = vpow2.f32 %v3087_v4 }
 0x13a   :  { %v3528_v8 = vpop.eup %3527 }
 0x13b   :  { %v3530_v11 = vpop.eup %3529 }
 0x13c   :  { %v3532_v12 = vpop.eup %3531  ;;  %v567_v35 = vmul.f32 %v3530_v11, %v3528_v8 }
 0x13d   :  { %v3534_v15 = vpop.eup %3533  ;;  %v566_v16 = vmul.f32 %v3532_v12, %v267_v10  ;;  %v584_v10 = vld [vmem:[#allocation2 + $0x18] sm:$0xc] }
 0x13e   :  { %v563_v39 = vadd.f32 1.0, %v3534_v15 }
 0x13f   :  { %v568_v40 = vadd.f32 %v567_v35, %v566_v16 }
 0x140   :  { %3535 = vrcp.f32 %v563_v39 }
 0x141   :  { %3537 = vtanh.f32 %v568_v40  ;;  %571 = vst [vmem:[#allocation4] sm:$0x3] %v568_v40 }
 0x148   :  { %v587_v39 = vld [vmem:[#allocation4] sm:$0x3] }
 0x14d   :  { %v3536_v48 = vpop.eup %3535 }
 0x14e   :  { %v3538_v49 = vpop.eup %3537 }
 0x14f   :  { %v570_v51 = vmul.f32 %v3538_v49, %v3536_v48  ;;  %v899_v49 = vrot.slane %v587_v39, 6 }
 0x151   :  { %572 = vst [vmem:[#allocation3] sm:$0x3] %v570_v51  ;;  %v580_v52 = vsel %vm579_vm3, %v570_v51, %v574_v50 }
 0x152   :  { %581 = vst [vmem:[#allocation5] sm:$0x3] %v580_v52 }
 0x158   :  { %v586_v53 = vld [vmem:[#allocation3] sm:$0x3] }
 0x159   :  { %v588_v54 = vpack.c.bf16 %v586_v53, %v586_v53 }
 0x15b   :  { %814 = vmatmul.mubr.bf16.vlgmr.msra.gmra.mxu0 %v588_v54  ;;  %855 = vmatmul.mubr.bf16.vlgmr.msra.gmra.mxu1 %v588_v54 }
 0x15c   :  { %1120 = vmatpush1.bf16.msra.mxu0 %v3841_v5  ;;  %1161 = vmatpush1.bf16.msra.mxu1 %v3869_v21  ;;  %v1248_v5 = vsel %vm1246_vm4, 1, %v3770_v0 }
 0x15d   :  { %1121 = vmatprep.subr.bf16.mxu0 %v3845_v7  ;;  %1162 = vmatprep.subr.bf16.mxu1 %v3877_v24 }
 0x15e   :  { %1151 = vmatprep.mubr.bf16.mxu0 %v3770_v0  ;;  %1192 = vmatprep.mubr.bf16.mxu1 %v3770_v0 }
 0x15f   :  { %1250 = vperm.xlu1 %3401, %v1248_v5  }
 0x160   :  { %1122 = vmatpush1.bf16.msra.mxu0 %v3847_v9  ;;  %1163 = vmatpush1.bf16.msra.mxu1 %v3880_v25 }
 0x161   :  { %1123 = vmatprep.subr.bf16.mxu0 %v3851_v13  ;;  %1164 = vmatprep.subr.bf16.mxu1 %v3890_v28 }
 0x164   :  { %1124 = vmatpush1.bf16.msra.mxu0 %v3853_v14  ;;  %1165 = vmatpush1.bf16.msra.mxu1 %v3893_v29 }
 0x165   :  { %1125 = vmatprep.subr.bf16.mxu0 %v3857_v17  ;;  %1166 = vmatprep.subr.bf16.mxu1 %v3903_v32 }
 0x168   :  { %1126 = vmatpush1.bf16.msra.mxu0 %v3860_v18  ;;  %1167 = vmatpush1.bf16.msra.mxu1 %v3905_v33 }
 0x169   :  { %1127 = vmatprep.subr.bf16.mxu0 %v3863_v19  ;;  %1168 = vmatprep.subr.bf16.mxu1 %v3911_v36 }
 0x16c   :  { %1128 = vmatpush1.bf16.msra.mxu0 %v3871_v22  ;;  %1169 = vmatpush1.bf16.msra.mxu1 %v3921_v38 }
 0x16d   :  { %1129 = vmatprep.subr.bf16.mxu0 %v3873_v23  ;;  %1170 = vmatprep.subr.bf16.mxu1 %v3924_v41 }
 0x170   :  { %1130 = vmatpush1.bf16.msra.mxu0 %v3884_v26  ;;  %1171 = vmatpush1.bf16.msra.mxu1 %v3930_v42 }
 0x171   :  { %1131 = vmatprep.subr.bf16.mxu0 %v3888_v27  ;;  %1172 = vmatprep.subr.bf16.mxu1 %v3932_v43 }
 0x174   :  { %1132 = vmatpush1.bf16.msra.mxu0 %v3895_v30  ;;  %1173 = vmatpush1.bf16.msra.mxu1 %v3938_v44  ;;  %v582_v30 = vld [vmem:[#allocation2 + $0x30] sm:$0xc] }
 0x175   :  { %1133 = vmatprep.subr.bf16.mxu0 %v3899_v31  ;;  %1174 = vmatprep.subr.bf16.mxu1 %v3941_v45 }
 0x178   :  { %1134 = vmatpush1.bf16.msra.mxu0 %v3907_v34  ;;  %1175 = vmatpush1.bf16.msra.mxu1 %v3948_v46 }
 0x179   :  { %1498 = vmatprep.subr.bf16.mxu1 %v3865_v20 }
 0x21b   :  { %v815_v7 = vpop.f32.mrf.mxu0  ;;  %v856_v9 = vpop.f32.mrf.mxu1 }
 0x21c   :  { %v867_v27 = vrot.slane %v815_v7, 6  ;;  %v869_v6 = vrot.slane %v856_v9, 6  ;;  %v913_v7 = vpop.permute.xlu0 %912 }
 0x21d   :  { %v817_v55 = vpop.f32.mrf.mxu0  ;;  %v858_v56 = vpop.f32.mrf.mxu1  ;;  %vm914_vm5 = vcmp.eq.s32.totalorder %v913_v7, 1 }
 0x21e   :  { %v875_v31 = vadd.f32 %v867_v27, %v582_v30  ;;  %v868_v57 = vrot.slane %v817_v55, 6  ;;  %v870_v2 = vrot.slane %v858_v56, 6  ;;  %v877_v12 = vadd.f32 %v869_v6, %v584_v10  ;;  %v909_v55 = vld [vmem:[#allocation5] sm:$0x3] }
 0x21f   :  { %v819_v59 = vpop.f32.mrf.mxu0  ;;  %v860_v34 = vpop.f32.mrf.mxu1 }
 0x220   :  { %v3120_v60 = vmul.f32 -1.442695, %v875_v31  ;;  %v876_v61 = vadd.f32 %v868_v57, %v583_v58  ;;  %v878_v4 = vadd.f32 %v870_v2, %v585_v3 }
 0x221   :  { %v820_v62 = vpop.f32.mrf.mxu0  ;;  %v861_v20 = vpop.f32.mrf.mxu1 }
 0x222   :  { %3539 = vpow2.f32 %v3120_v60  ;;  %v3121_v63 = vmul.f32 -1.442695, %v876_v61  ;;  %v3122_v8 = vmul.f32 -1.442695, %v878_v4  ;;  %v923_v60 = vld [vmem:[#allocation2 + $0x10] sm:$0x30] }
 0x224   :  { %3541 = vpow2.f32 %v3121_v63  ;;  %v922_v63 = vld [vmem:[#allocation2 + $0x18] sm:$0x30] }
 0x225   :  { %3543 = vpow2.f32 %v3122_v8 }
 0x22f   :  { %v3540_v11 = vpop.eup %3539 }
 0x230   :  { %v882_v15 = vadd.f32 1.0, %v3540_v11 }
 0x231   :  { %v3542_v16 = vpop.eup %3541 }
 0x232   :  { %3545 = vrcp.f32 %v882_v15  ;;  %v888_v35 = vadd.f32 1.0, %v3542_v16  ;;  %v3544_v40 = vpop.eup %3543 }
 0x233   :  { %3547 = vtanh.f32 %v877_v12  ;;  %v895_v51 = vadd.f32 1.0, %v3544_v40 }
 0x234   :  { %3549 = vrcp.f32 %v888_v35 }
 0x235   :  { %3551 = vrcp.f32 %v895_v51 }
 0x23f   :  { %v3546_v47 = vpop.eup %3545 }
 0x240   :  { %v3548_v48 = vpop.eup %3547 }
 0x241   :  { %v3550_v50 = vpop.eup %3549  ;;  %v902_v52 = vmul.f32 %v3548_v48, %v3546_v47 }
 0x242   :  { %v901_v53 = vmul.f32 %v3550_v50, %v899_v49  ;;  %v3552_v5 = vpop.eup %3551  ;;  %v1251_v50 = vpop.permute.xlu1 %1250 }
 0x243   :  { %vm1252_vm7 = vcmp.eq.s32.totalorder %v1251_v50, 1  ;;  %v1260_v50 = vld [vmem:[#allocation2 + $0x18] sm:$0xc0] }
 0x244   :  { %v903_v54 = vadd.f32 %v902_v52, %v901_v53 }
 0x246   :  { %906 = vst [vmem:[#allocation4 - $0x2] sm:$0xc] %v903_v54  ;;  %3553 = vtanh.f32 %v903_v54 }
 0x24d   :  { %v925_v10 = vld [vmem:[#allocation4] sm:$0x3] }
 0x24e   :  { %v1237_v16 = vrot.slane %v925_v10, 4 }
 0x253   :  { %v3554_v9 = vpop.eup %3553 }
 0x254   :  { %v905_v27 = vmul.f32 %v3554_v9, %v3552_v5 }
 0x256   :  { %907 = vst [vmem:[#allocation3 - $0x2] sm:$0xc] %v905_v27  ;;  %v916_v30 = vrot.slane %v905_v27, 2  ;;  %v4079_v27 = vld [vmem:[#allocation11 + $0xec] ss:$16 sps:$4 sm:$0xff]  }
 0x258   :  { %v918_v56 = vsel %vm914_vm5, %v916_v30, %v909_v55  ;;  %v4081_v30 = vld [vmem:[#allocation11 + $0xe8] ss:$16 sps:$4 sm:$0xff]   ;;  %v4085_v55 = vld [vmem:[#allocation11 + $0xcc] ss:$16 sps:$4 sm:$0xff]  }
 0x259   :  { %919 = vst [vmem:[#allocation5] sm:$0x3] %v918_v56  ;;  %v4087_v56 = vld [vmem:[#allocation11 + $0xc8] ss:$16 sps:$4 sm:$0xff]  }
 0x25d   :  { %v924_v31 = vld [vmem:[#allocation3] sm:$0x3] }
 0x25e   :  { %v926_v57 = vpack.c.bf16 %v924_v31, %v924_v31  ;;  %v4091_v31 = vld [vmem:[#allocation11 + $0xa0] ss:$16 sps:$4 sm:$0xff]  }
 0x260   :  { %1152 = vmatmul.mubr.bf16.vlgmr.msra.gmra.mxu0 %v926_v57  ;;  %1193 = vmatmul.mubr.bf16.vlgmr.msra.gmra.mxu1 %v926_v57  ;;  %v1247_v54 = vld [vmem:[#allocation5] sm:$0x3] }
 0x261   :  { %1499 = vmatpush1.bf16.msra.mxu1 %v3869_v21  ;;  %1489 = vmatprep.mubr.bf16.mxu0 %v3770_v0  ;;  %v4039_v21 = vld [vmem:[#allocation11 + $0xe4] ss:$16 sps:$4 sm:$0xff]  }
 0x262   :  { %1500 = vmatprep.subr.bf16.mxu1 %v3877_v24  ;;  %1530 = vmatprep.mubr.bf16.mxu1 %v3770_v0  ;;  %v4041_v24 = vld [vmem:[#allocation11 + $0xe0] ss:$16 sps:$4 sm:$0xff]   ;;  %v4093_v57 = vld [vmem:[#allocation11 + $0xa4] ss:$16 sps:$4 sm:$0xff]  }
 0x263   :  { %1457 = vmatprep.subr.bf16.mxu0 %v4039_v21 }
 0x264   :  { %1458 = vmatpush1.bf16.msra.mxu0 %v4041_v24 }
 0x265   :  { %1501 = vmatpush1.bf16.msra.mxu1 %v3880_v25  ;;  %v4045_v25 = vld [vmem:[#allocation11 + $0xc4] ss:$16 sps:$4 sm:$0xff]  }
 0x266   :  { %1502 = vmatprep.subr.bf16.mxu1 %v3890_v28  ;;  %v4047_v28 = vld [vmem:[#allocation11 + $0xc0] ss:$16 sps:$4 sm:$0xff]   ;;  %1459 = vmatprep.subr.bf16.mxu0 %v4045_v25 }
 0x268   :  { %1460 = vmatpush1.bf16.msra.mxu0 %v4047_v28 }
 0x269   :  { %1503 = vmatpush1.bf16.msra.mxu1 %v3893_v29  ;;  %1461 = vmatprep.subr.bf16.mxu0 %v3851_v13  ;;  %v4059_v29 = vld [vmem:[#allocation11 + $0x24] ss:$16 sps:$4 sm:$0xff]  }
 0x26a   :  { %1504 = vmatprep.subr.bf16.mxu1 %v3903_v32  ;;  %v4061_v32 = vld [vmem:[#allocation11 + $0x20] ss:$16 sps:$4 sm:$0xff]   ;;  %v4064_v13 = vld [vmem:[#allocation11 + $0x4] ss:$16 sps:$4 sm:$0xff]  }
 0x26c   :  { %1462 = vmatpush1.bf16.msra.mxu0 %v3853_v14  ;;  %v4067_v14 = vld [vmem:[#allocation11] ss:$16 sps:$4 sm:$0xff]  }
 0x26d   :  { %1505 = vmatpush1.bf16.msra.mxu1 %v3905_v33  ;;  %1463 = vmatprep.subr.bf16.mxu0 %v3857_v17  ;;  %v1586_v17 = vsel %vm1584_vm6, 1, %v3770_v0 }
 0x26e   :  { %1506 = vmatprep.subr.bf16.mxu1 %v3911_v36  ;;  %1588 = vperm.xlu1 %3401, %v1586_v17   ;;  %v4095_v17 = vld [vmem:[#allocation11 + $0xa8] ss:$16 sps:$4 sm:$0xff]  }
 0x270   :  { %1464 = vmatpush1.bf16.msra.mxu0 %v3860_v18 }
 0x271   :  { %1507 = vmatpush1.bf16.msra.mxu1 %v3921_v38  ;;  %1465 = vmatprep.subr.bf16.mxu0 %v3863_v19 }
 0x272   :  { %1508 = vmatprep.subr.bf16.mxu1 %v3924_v41  ;;  %v921_v41 = vld [vmem:[#allocation2] sm:$0x30] }
 0x274   :  { %1466 = vmatpush1.bf16.msra.mxu0 %v3871_v22 }
 0x275   :  { %1509 = vmatpush1.bf16.msra.mxu1 %v3930_v42  ;;  %1467 = vmatprep.subr.bf16.mxu0 %v3873_v23  ;;  %v920_v23 = vld [vmem:[#allocation2 + $0x30] sm:$0x30] }
 0x276   :  { %1510 = vmatprep.subr.bf16.mxu1 %v3932_v43 }
 0x278   :  { %1468 = vmatpush1.bf16.msra.mxu0 %v3884_v26 }
 0x279   :  { %1511 = vmatpush1.bf16.msra.mxu1 %v3938_v44  ;;  %1469 = vmatprep.subr.bf16.mxu0 %v4059_v29 }
 0x27a   :  { %1512 = vmatprep.subr.bf16.mxu1 %v3941_v45 }
 0x27c   :  { %1470 = vmatpush1.bf16.msra.mxu0 %v4061_v32 }
 0x27d   :  { %1513 = vmatpush1.bf16.msra.mxu1 %v3948_v46  ;;  %1471 = vmatprep.subr.bf16.mxu0 %v4064_v13 }
 0x27e   :  { %1836 = vmatprep.subr.bf16.mxu1 %v4079_v27 }
 0x280   :  { %1472 = vmatpush1.bf16.msra.mxu0 %v4067_v14 }
 0x281   :  { %1795 = vmatprep.subr.bf16.mxu0 %v4039_v21 }
 0x320   :  { %v1153_v18 = vpop.f32.mrf.mxu0  ;;  %v1194_v19 = vpop.f32.mrf.mxu1 }
 0x321   :  { %v1205_v22 = vrot.slane %v1153_v18, 4  ;;  %v1207_v62 = vrot.slane %v1194_v19, 4  ;;  %v4097_v18 = vld [vmem:[#allocation11 + $0xac] ss:$16 sps:$4 sm:$0xff]   ;;  %v4099_v19 = vld [vmem:[#allocation11 + $0x84] ss:$16 sps:$4 sm:$0xff]  }
 0x322   :  { %v1155_v26 = vpop.f32.mrf.mxu0  ;;  %v1196_v33 = vpop.f32.mrf.mxu1 }
 0x323   :  { %v1213_v36 = vadd.f32 %v1205_v22, %v920_v23  ;;  %v1206_v38 = vrot.slane %v1155_v26, 4  ;;  %v1208_v34 = vrot.slane %v1196_v33, 4  ;;  %v1215_v3 = vadd.f32 %v1207_v62, %v922_v63  ;;  %v4102_v22 = vld [vmem:[#allocation11 + $0x8c] ss:$16 sps:$4 sm:$0xff]   ;;  %v4106_v23 = vld [vmem:[#allocation11 + $0x80] ss:$16 sps:$4 sm:$0xff]  }
 0x324   :  { %v1157_v42 = vpop.f32.mrf.mxu0  ;;  %v1198_v43 = vpop.f32.mrf.mxu1  ;;  %v4110_v26 = vld [vmem:[#allocation11 + $0x88] ss:$16 sps:$4 sm:$0xff]   ;;  %v4112_v33 = vld [vmem:[#allocation11 + $0x64] ss:$16 sps:$4 sm:$0xff]  }
 0x325   :  { %v3155_v44 = vmul.f32 -1.442695, %v1213_v36  ;;  %v1214_v45 = vadd.f32 %v1206_v38, %v921_v41  ;;  %v1216_v61 = vadd.f32 %v1208_v34, %v923_v60  ;;  %v4115_v36 = vld [vmem:[#allocation11 + $0x6c] ss:$16 sps:$4 sm:$0xff]   ;;  %v4118_v38 = vld [vmem:[#allocation11 + $0x60] ss:$16 sps:$4 sm:$0xff]  }
 0x326   :  { %v1158_v46 = vpop.f32.mrf.mxu0  ;;  %v1199_v58 = vpop.f32.mrf.mxu1  ;;  %v4122_v41 = vld [vmem:[#allocation11 + $0x68] ss:$16 sps:$4 sm:$0xff]   ;;  %v4124_v42 = vld [vmem:[#allocation11 + $0x44] ss:$16 sps:$4 sm:$0xff]   ;;  %v4127_v43 = vld [vmem:[#allocation11 + $0x4c] ss:$16 sps:$4 sm:$0xff]  }
 0x327   :  { %3555 = vpow2.f32 %v3155_v44  ;;  %v3156_v59 = vmul.f32 -1.442695, %v1214_v45  ;;  %v3157_v20 = vmul.f32 -1.442695, %v1216_v61  ;;  %v4130_v44 = vld [vmem:[#allocation11 + $0x40] ss:$16 sps:$4 sm:$0xff]  }
 0x328   :  { %v4134_v45 = vld [vmem:[#allocation11 + $0x48] ss:$16 sps:$4 sm:$0xff]   ;;  %v4140_v46 = vld [vmem:[#allocation11 + $0x2c] ss:$16 sps:$4 sm:$0xff]   ;;  %v1909_v60 = vsel %vm1907_vm8, 1, %v3770_v0 }
 0x329   :  { %3557 = vpow2.f32 %v3156_v59  ;;  %v4142_v58 = vld [vmem:[#allocation11 + $0x28] ss:$16 sps:$4 sm:$0xff]   ;;  %v4146_v59 = vld [vmem:[#allocation11 + $0xc] ss:$16 sps:$4 sm:$0xff]   ;;  %1911 = vperm.xlu0 %3400, %v1909_v60  }
 0x32a   :  { %3559 = vpow2.f32 %v3157_v20  ;;  %v4150_v34 = vld [vmem:[#allocation11 + $0x8] ss:$16 sps:$4 sm:$0xff]  }
 0x32b   :  { %v1258_v63 = vld [vmem:[#allocation2 + $0x30] sm:$0xc0] }
 0x334   :  { %v3556_v2 = vpop.eup %3555 }
 0x335   :  { %v1220_v4 = vadd.f32 1.0, %v3556_v2 }
 0x336   :  { %v3558_v6 = vpop.eup %3557 }
 0x337   :  { %3561 = vrcp.f32 %v1220_v4  ;;  %v1226_v8 = vadd.f32 1.0, %v3558_v6  ;;  %v3560_v11 = vpop.eup %3559 }
 0x338   :  { %3563 = vtanh.f32 %v1215_v3  ;;  %v1233_v39 = vadd.f32 1.0, %v3560_v11 }
 0x339   :  { %3565 = vrcp.f32 %v1226_v8  ;;  %v1259_v8 = vld [vmem:[#allocation2] sm:$0xc0] }
 0x33a   :  { %3567 = vrcp.f32 %v1233_v39 }
 0x344   :  { %v3562_v12 = vpop.eup %3561 }
 0x345   :  { %v3564_v15 = vpop.eup %3563 }
 0x346   :  { %v3566_v35 = vpop.eup %3565  ;;  %v1240_v40 = vmul.f32 %v3564_v15, %v3562_v12 }
 0x347   :  { %v1239_v47 = vmul.f32 %v3566_v35, %v1237_v16  ;;  %v3568_v49 = vpop.eup %3567 }
 0x349   :  { %v1241_v48 = vadd.f32 %v1240_v40, %v1239_v47  ;;  %v1261_v40 = vld [vmem:[#allocation2 + $0x10] sm:$0xc0] }
 0x34b   :  { %1244 = vst [vmem:[#allocation4 - $0x4] sm:$0x30] %v1241_v48  ;;  %3569 = vtanh.f32 %v1241_v48 }
 0x358   :  { %v3570_v51 = vpop.eup %3569 }
 0x359   :  { %v1243_v52 = vmul.f32 %v3570_v51, %v3568_v49 }
 0x35b   :  { %1245 = vst [vmem:[#allocation3 - $0x4] sm:$0x30] %v1243_v52  ;;  %v1254_v53 = vrot.slane %v1243_v52, 4 }
 0x35d   :  { %v1256_v5 = vsel %vm1252_vm7, %v1254_v53, %v1247_v54 }
 0x35e   :  { %1257 = vst [vmem:[#allocation5] sm:$0x3] %v1256_v5 }
 0x362   :  { %v1262_v7 = vld [vmem:[#allocation3] sm:$0x3] }
 0x363   :  { %v1264_v9 = vpack.c.bf16 %v1262_v7, %v1262_v7  ;;  %v1263_v7 = vld [vmem:[#allocation4] sm:$0x3] }
 0x365   :  { %1490 = vmatmul.mubr.bf16.vlgmr.msra.gmra.mxu0 %v1264_v9  ;;  %1531 = vmatmul.mubr.bf16.vlgmr.msra.gmra.mxu1 %v1264_v9 }
 0x366   :  { %1796 = vmatpush1.bf16.msra.mxu0 %v4041_v24  ;;  %1827 = vmatprep.mubr.bf16.mxu0 %v3770_v0 }
 0x367   :  { %1797 = vmatprep.subr.bf16.mxu0 %v4045_v25  ;;  %1868 = vmatprep.mubr.bf16.mxu1 %v3770_v0 }
 0x368   :  { %1837 = vmatpush1.bf16.msra.mxu1 %v4081_v30 }
 0x369   :  { %1838 = vmatprep.subr.bf16.mxu1 %v4085_v55 }
 0x36a   :  { %1798 = vmatpush1.bf16.msra.mxu0 %v4047_v28 }
 0x36b   :  { %1799 = vmatprep.subr.bf16.mxu0 %v4093_v57 }
 0x36c   :  { %1839 = vmatpush1.bf16.msra.mxu1 %v4087_v56 }
 0x36d   :  { %1840 = vmatprep.subr.bf16.mxu1 %v4097_v18 }
 0x36e   :  { %1800 = vmatpush1.bf16.msra.mxu0 %v4091_v31 }
 0x36f   :  { %1801 = vmatprep.subr.bf16.mxu0 %v4099_v19 }
 0x370   :  { %1841 = vmatpush1.bf16.msra.mxu1 %v4095_v17 }
 0x371   :  { %1842 = vmatprep.subr.bf16.mxu1 %v4102_v22 }
 0x372   :  { %1802 = vmatpush1.bf16.msra.mxu0 %v4106_v23 }
 0x373   :  { %1803 = vmatprep.subr.bf16.mxu0 %v4112_v33 }
 0x374   :  { %1843 = vmatpush1.bf16.msra.mxu1 %v4110_v26 }
 0x375   :  { %1844 = vmatprep.subr.bf16.mxu1 %v4115_v36 }
 0x376   :  { %1804 = vmatpush1.bf16.msra.mxu0 %v4118_v38 }
 0x377   :  { %1805 = vmatprep.subr.bf16.mxu0 %v4124_v42 }
 0x378   :  { %1845 = vmatpush1.bf16.msra.mxu1 %v4122_v41 }
 0x379   :  { %1846 = vmatprep.subr.bf16.mxu1 %v4127_v43 }
 0x37a   :  { %1806 = vmatpush1.bf16.msra.mxu0 %v4130_v44 }
 0x37b   :  { %1807 = vmatprep.subr.bf16.mxu0 %v4059_v29 }
 0x37c   :  { %1847 = vmatpush1.bf16.msra.mxu1 %v4134_v45 }
 0x37d   :  { %1848 = vmatprep.subr.bf16.mxu1 %v4140_v46 }
 0x37e   :  { %1808 = vmatpush1.bf16.msra.mxu0 %v4061_v32 }
 0x37f   :  { %1809 = vmatprep.subr.bf16.mxu0 %v4064_v13 }
 0x380   :  { %1849 = vmatpush1.bf16.msra.mxu1 %v4142_v58 }
 0x381   :  { %1850 = vmatprep.subr.bf16.mxu1 %v4146_v59 }
 0x382   :  { %1810 = vmatpush1.bf16.msra.mxu0 %v4067_v14 }
 0x383   :  { %2115 = vmatprep.subr.bf16.mxu0 %v4039_v21 }
 0x384   :  { %1851 = vmatpush1.bf16.msra.mxu1 %v4150_v34 }
 0x385   :  { %2156 = vmatprep.subr.bf16.mxu1 %v4079_v27 }
 0x425   :  { %v1491_v61 = vpop.f32.mrf.mxu0  ;;  %v1532_v62 = vpop.f32.mrf.mxu1 }
 0x426   :  { %v1543_v20 = vrot.slane %v1491_v61, 2  ;;  %v1545_v48 = vrot.slane %v1532_v62, 2 }
 0x427   :  { %v1493_v2 = vpop.f32.mrf.mxu0  ;;  %v1534_v3 = vpop.f32.mrf.mxu1 }
 0x428   :  { %v1551_v4 = vadd.f32 %v1543_v20, %v1258_v63  ;;  %v1544_v6 = vrot.slane %v1493_v2, 2  ;;  %v1546_v39 = vrot.slane %v1534_v3, 2  ;;  %v1553_v52 = vadd.f32 %v1545_v48, %v1260_v50 }
 0x429   :  { %v1495_v10 = vpop.f32.mrf.mxu0  ;;  %v1536_v11 = vpop.f32.mrf.mxu1  ;;  %v1575_v20 = vrot.slane %v1263_v7, 2 }
 0x42a   :  { %v3190_v12 = vmul.f32 -1.442695, %v1551_v4  ;;  %v1552_v15 = vadd.f32 %v1544_v6, %v1259_v8  ;;  %v1554_v47 = vadd.f32 %v1546_v39, %v1261_v40  ;;  %v1589_v8 = vpop.permute.xlu1 %1588  ;;  %v4196_v39 = vld [vmem:[%s4286_s1] sm:$0x3] }
 0x42b   :  { %v1496_v16 = vpop.f32.mrf.mxu0  ;;  %v1537_v35 = vpop.f32.mrf.mxu1  ;;  %vm1590_vm9 = vcmp.eq.s32.totalorder %v1589_v8, 1  ;;  %vm2242_vm10 = vcmp.eq.s32.totalorder %v4196_v39, 5  ;;  %vm2580_vm12 = vcmp.eq.s32.totalorder %v4196_v39, 6  ;;  %vm2918_vm14 = vcmp.eq.s32.totalorder %v4196_v39, 7 }
 0x42c   :  { %3571 = vpow2.f32 %v3190_v12  ;;  %v3191_v37 = vmul.f32 -1.442695, %v1552_v15  ;;  %v3192_v49 = vmul.f32 -1.442695, %v1554_v47  ;;  %v1585_v15 = vld [vmem:[#allocation5] sm:$0x3] }
 0x42d   :  { %v2244_v40 = vsel %vm2242_vm10, 1, %v3770_v0  ;;  %v1596_v47 = vld [vmem:[#allocation2 + $0x8] sm:$0x3] }
 0x42e   :  { %3573 = vpow2.f32 %v3191_v37  ;;  %2246 = vperm.xlu1 %3401, %v2244_v40  }
 0x42f   :  { %3575 = vpow2.f32 %v3192_v49 }
 0x439   :  { %v3572_v51 = vpop.eup %3571 }
 0x43a   :  { %v1558_v53 = vadd.f32 1.0, %v3572_v51  ;;  %v1597_v51 = vld [vmem:[#allocation2 + $0x20] sm:$0x3] }
 0x43b   :  { %v3574_v54 = vpop.eup %3573 }
 0x43c   :  { %3577 = vrcp.f32 %v1558_v53  ;;  %v1564_v5 = vadd.f32 1.0, %v3574_v54  ;;  %v3576_v9 = vpop.eup %3575 }
 0x43d   :  { %3579 = vtanh.f32 %v1553_v52  ;;  %v1571_v2 = vadd.f32 1.0, %v3576_v9 }
 0x43e   :  { %3581 = vrcp.f32 %v1564_v5 }
 0x43f   :  { %3583 = vrcp.f32 %v1571_v2 }
 0x449   :  { %v3578_v60 = vpop.eup %3577 }
 0x44a   :  { %v3580_v61 = vpop.eup %3579 }
 0x44b   :  { %v3582_v63 = vpop.eup %3581  ;;  %v1578_v3 = vmul.f32 %v3580_v61, %v3578_v60 }
 0x44c   :  { %v1577_v62 = vmul.f32 %v3582_v63, %v1575_v20  ;;  %v3584_v6 = vpop.eup %3583  ;;  %v1599_v20 = vld [vmem:[#allocation2 + $0x38] sm:$0x3] }
 0x44e   :  { %v1579_v4 = vadd.f32 %v1578_v3, %v1577_v62  ;;  %v1598_v3 = vld [vmem:[#allocation2 + $0x28] sm:$0x3] }
 0x450   :  { %1582 = vst [vmem:[#allocation4 - $0x6] sm:$0xc0] %v1579_v4  ;;  %3585 = vtanh.f32 %v1579_v4 }
 0x45d   :  { %v3586_v10 = vpop.eup %3585 }
 0x45e   :  { %v1581_v11 = vmul.f32 %v3586_v10, %v3584_v6 }
 0x460   :  { %1583 = vst [vmem:[#allocation3 - $0x6] sm:$0xc0] %v1581_v11  ;;  %v1592_v12 = vrot.slane %v1581_v11, 6 }
 0x462   :  { %v1594_v16 = vsel %vm1590_vm9, %v1592_v12, %v1585_v15 }
 0x463   :  { %1595 = vst [vmem:[#allocation5] sm:$0x3] %v1594_v16 }
 0x467   :  { %v1600_v35 = vld [vmem:[#allocation3] sm:$0x3] }
 0x468   :  { %v1602_v37 = vpack.c.bf16 %v1600_v35, %v1600_v35  ;;  %v1601_v35 = vld [vmem:[#allocation4] sm:$0x3] }
 0x46a   :  { %1828 = vmatmul.mubr.bf16.vlgmr.msra.gmra.mxu0 %v1602_v37  ;;  %1869 = vmatmul.mubr.bf16.vlgmr.msra.gmra.mxu1 %v1602_v37 }
 0x46b   :  { %2116 = vmatpush1.bf16.msra.mxu0 %v4041_v24  ;;  %2157 = vmatpush1.bf16.msra.mxu1 %v4081_v30 }
 0x46c   :  { %2117 = vmatprep.subr.bf16.mxu0 %v4045_v25  ;;  %2158 = vmatprep.subr.bf16.mxu1 %v4085_v55 }
 0x46d   :  { %2147 = vmatprep.mubr.bf16.mxu0 %v3770_v0  ;;  %2188 = vmatprep.mubr.bf16.mxu1 %v3770_v0 }
 0x46f   :  { %2118 = vmatpush1.bf16.msra.mxu0 %v4047_v28  ;;  %2159 = vmatpush1.bf16.msra.mxu1 %v4087_v56 }
 0x470   :  { %2119 = vmatprep.subr.bf16.mxu0 %v4093_v57  ;;  %2160 = vmatprep.subr.bf16.mxu1 %v4097_v18 }
 0x473   :  { %2120 = vmatpush1.bf16.msra.mxu0 %v4091_v31  ;;  %2161 = vmatpush1.bf16.msra.mxu1 %v4095_v17 }
 0x474   :  { %2121 = vmatprep.subr.bf16.mxu0 %v4099_v19  ;;  %2162 = vmatprep.subr.bf16.mxu1 %v4102_v22 }
 0x477   :  { %2122 = vmatpush1.bf16.msra.mxu0 %v4106_v23  ;;  %2163 = vmatpush1.bf16.msra.mxu1 %v4110_v26 }
 0x478   :  { %2123 = vmatprep.subr.bf16.mxu0 %v4112_v33  ;;  %2164 = vmatprep.subr.bf16.mxu1 %v4115_v36 }
 0x47b   :  { %2124 = vmatpush1.bf16.msra.mxu0 %v4118_v38  ;;  %2165 = vmatpush1.bf16.msra.mxu1 %v4122_v41 }
 0x47c   :  { %2125 = vmatprep.subr.bf16.mxu0 %v4124_v42  ;;  %2166 = vmatprep.subr.bf16.mxu1 %v4127_v43 }
 0x47f   :  { %2126 = vmatpush1.bf16.msra.mxu0 %v4130_v44  ;;  %2167 = vmatpush1.bf16.msra.mxu1 %v4134_v45 }
 0x480   :  { %2127 = vmatprep.subr.bf16.mxu0 %v4059_v29  ;;  %2168 = vmatprep.subr.bf16.mxu1 %v4140_v46 }
 0x483   :  { %2128 = vmatpush1.bf16.msra.mxu0 %v4061_v32  ;;  %2169 = vmatpush1.bf16.msra.mxu1 %v4142_v58 }
 0x484   :  { %2129 = vmatprep.subr.bf16.mxu0 %v4064_v13  ;;  %2170 = vmatprep.subr.bf16.mxu1 %v4146_v59 }
 0x487   :  { %2130 = vmatpush1.bf16.msra.mxu0 %v4067_v14  ;;  %2171 = vmatpush1.bf16.msra.mxu1 %v4150_v34 }
 0x488   :  { %2453 = vmatprep.subr.bf16.mxu0 %v4039_v21  ;;  %2494 = vmatprep.subr.bf16.mxu1 %v4079_v27 }
 0x52a   :  { %v1829_v48 = vpop.f32.mrf.mxu0  ;;  %v1870_v49 = vpop.f32.mrf.mxu1 }
 0x52b   :  { %v1877_v50 = vadd.f32 %v1829_v48, %v1596_v47  ;;  %v1879_v4 = vadd.f32 %v1870_v49, %v1598_v3  ;;  %v1912_v49 = vpop.permute.xlu0 %1911 }
 0x52c   :  { %v1831_v52 = vpop.f32.mrf.mxu0  ;;  %v1872_v53 = vpop.f32.mrf.mxu1  ;;  %vm1913_vm11 = vcmp.eq.s32.totalorder %v1912_v49, 1 }
 0x52d   :  { %v3225_v21 = vmul.f32 -1.442695, %v1877_v50  ;;  %v1878_v54 = vadd.f32 %v1831_v52, %v1597_v51  ;;  %v1880_v63 = vadd.f32 %v1872_v53, %v1599_v20  ;;  %v1908_v53 = vld [vmem:[#allocation5] sm:$0x3] }
 0x52e   :  { %v1833_v5 = vpop.f32.mrf.mxu0  ;;  %v1874_v7 = vpop.f32.mrf.mxu1 }
 0x52f   :  { %3587 = vpow2.f32 %v3225_v21  ;;  %v3226_v9 = vmul.f32 -1.442695, %v1878_v54  ;;  %v3227_v2 = vmul.f32 -1.442695, %v1880_v63 }
 0x530   :  { %v1834_v60 = vpop.f32.mrf.mxu0  ;;  %v1875_v61 = vpop.f32.mrf.mxu1 }
 0x531   :  { %3589 = vpow2.f32 %v3226_v9  ;;  %v1917_v61 = vld [vmem:[#allocation2 + $0x20] sm:$0xc] }
 0x532   :  { %3591 = vpow2.f32 %v3227_v2 }
 0x53c   :  { %v3588_v62 = vpop.eup %3587 }
 0x53d   :  { %v1884_v6 = vadd.f32 1.0, %v3588_v62 }
 0x53e   :  { %v3590_v8 = vpop.eup %3589 }
 0x53f   :  { %3593 = vrcp.f32 %v1884_v6  ;;  %v1890_v10 = vadd.f32 1.0, %v3590_v8  ;;  %v3592_v11 = vpop.eup %3591  ;;  %v1919_v6 = vld [vmem:[#allocation2 + $0x38] sm:$0xc] }
 0x540   :  { %3595 = vtanh.f32 %v1879_v4  ;;  %v1897_v37 = vadd.f32 1.0, %v3592_v11 }
 0x541   :  { %3597 = vrcp.f32 %v1890_v10 }
 0x542   :  { %3599 = vrcp.f32 %v1897_v37 }
 0x54c   :  { %v3594_v12 = vpop.eup %3593 }
 0x54d   :  { %v3596_v15 = vpop.eup %3595 }
 0x54e   :  { %v3598_v16 = vpop.eup %3597  ;;  %v1901_v40 = vmul.f32 %v3596_v15, %v3594_v12  ;;  %v1918_v12 = vld [vmem:[#allocation2 + $0x28] sm:$0xc] }
 0x54f   :  { %v1900_v47 = vmul.f32 %v3598_v16, %v1601_v35  ;;  %v3600_v50 = vpop.eup %3599 }
 0x551   :  { %v1902_v48 = vadd.f32 %v1901_v40, %v1900_v47 }
 0x553   :  { %1905 = vst [vmem:[#allocation4] sm:$0x3] %v1902_v48  ;;  %3601 = vtanh.f32 %v1902_v48 }
 0x55a   :  { %v1921_v47 = vld [vmem:[#allocation4] sm:$0x3] }
 0x560   :  { %v3602_v51 = vpop.eup %3601 }
 0x561   :  { %v1904_v52 = vmul.f32 %v3602_v51, %v3600_v50  ;;  %v2233_v51 = vrot.slane %v1921_v47, 6 }
 0x563   :  { %1906 = vst [vmem:[#allocation3] sm:$0x3] %v1904_v52  ;;  %v1914_v21 = vsel %vm1913_vm11, %v1904_v52, %v1908_v53 }
 0x564   :  { %1915 = vst [vmem:[#allocation5] sm:$0x3] %v1914_v21 }
 0x56a   :  { %v1920_v54 = vld [vmem:[#allocation3] sm:$0x3] }
 0x56b   :  { %v1922_v5 = vpack.c.bf16 %v1920_v54, %v1920_v54 }
 0x56d   :  { %2148 = vmatmul.mubr.bf16.vlgmr.msra.gmra.mxu0 %v1922_v5  ;;  %2189 = vmatmul.mubr.bf16.vlgmr.msra.gmra.mxu1 %v1922_v5 }
 0x56e   :  { %2454 = vmatpush1.bf16.msra.mxu0 %v4041_v24  ;;  %2495 = vmatpush1.bf16.msra.mxu1 %v4081_v30  ;;  %v2582_v24 = vsel %vm2580_vm12, 1, %v3770_v0 }
 0x56f   :  { %2455 = vmatprep.subr.bf16.mxu0 %v4045_v25  ;;  %2496 = vmatprep.subr.bf16.mxu1 %v4085_v55 }
 0x570   :  { %2485 = vmatprep.mubr.bf16.mxu0 %v3770_v0  ;;  %2526 = vmatprep.mubr.bf16.mxu1 %v3770_v0 }
 0x571   :  { %2584 = vperm.xlu0 %3400, %v2582_v24  }
 0x572   :  { %2456 = vmatpush1.bf16.msra.mxu0 %v4047_v28  ;;  %2497 = vmatpush1.bf16.msra.mxu1 %v4087_v56 }
 0x573   :  { %2457 = vmatprep.subr.bf16.mxu0 %v4093_v57  ;;  %2498 = vmatprep.subr.bf16.mxu1 %v4097_v18 }
 0x576   :  { %2458 = vmatpush1.bf16.msra.mxu0 %v4091_v31  ;;  %2499 = vmatpush1.bf16.msra.mxu1 %v4095_v17 }
 0x577   :  { %2459 = vmatprep.subr.bf16.mxu0 %v4099_v19  ;;  %2500 = vmatprep.subr.bf16.mxu1 %v4102_v22 }
 0x57a   :  { %2460 = vmatpush1.bf16.msra.mxu0 %v4106_v23  ;;  %2501 = vmatpush1.bf16.msra.mxu1 %v4110_v26 }
 0x57b   :  { %2461 = vmatprep.subr.bf16.mxu0 %v4112_v33  ;;  %2502 = vmatprep.subr.bf16.mxu1 %v4115_v36 }
 0x57e   :  { %2462 = vmatpush1.bf16.msra.mxu0 %v4118_v38  ;;  %2503 = vmatpush1.bf16.msra.mxu1 %v4122_v41 }
 0x57f   :  { %2463 = vmatprep.subr.bf16.mxu0 %v4124_v42  ;;  %2504 = vmatprep.subr.bf16.mxu1 %v4127_v43 }
 0x582   :  { %2464 = vmatpush1.bf16.msra.mxu0 %v4130_v44  ;;  %2505 = vmatpush1.bf16.msra.mxu1 %v4134_v45 }
 0x583   :  { %2465 = vmatprep.subr.bf16.mxu0 %v4059_v29  ;;  %2506 = vmatprep.subr.bf16.mxu1 %v4140_v46 }
 0x586   :  { %2466 = vmatpush1.bf16.msra.mxu0 %v4061_v32  ;;  %2507 = vmatpush1.bf16.msra.mxu1 %v4142_v58  ;;  %v1916_v32 = vld [vmem:[#allocation2 + $0x8] sm:$0xc] }
 0x587   :  { %2467 = vmatprep.subr.bf16.mxu0 %v4064_v13  ;;  %2508 = vmatprep.subr.bf16.mxu1 %v4146_v59 }
 0x58a   :  { %2468 = vmatpush1.bf16.msra.mxu0 %v4067_v14  ;;  %2509 = vmatpush1.bf16.msra.mxu1 %v4150_v34 }
 0x58b   :  { %2832 = vmatprep.subr.bf16.mxu1 %v4079_v27 }
 0x62d   :  { %v2149_v25 = vpop.f32.mrf.mxu0  ;;  %v2190_v28 = vpop.f32.mrf.mxu1 }
 0x62e   :  { %v2201_v29 = vrot.slane %v2149_v25, 6  ;;  %v2203_v10 = vrot.slane %v2190_v28, 6  ;;  %v2247_v25 = vpop.permute.xlu1 %2246 }
 0x62f   :  { %v2151_v7 = vpop.f32.mrf.mxu0  ;;  %v2192_v9 = vpop.f32.mrf.mxu1  ;;  %vm2248_vm13 = vcmp.eq.s32.totalorder %v2247_v25, 1  ;;  %v2946_v25 = vld [vmem:[#allocation12 + $0x78] sm:$0xff] }
 0x630   :  { %v2209_v13 = vadd.f32 %v2201_v29, %v1916_v32  ;;  %v2202_v60 = vrot.slane %v2151_v7, 6  ;;  %v2204_v4 = vrot.slane %v2192_v9, 6  ;;  %v2211_v16 = vadd.f32 %v2203_v10, %v1918_v12  ;;  %v2243_v7 = vld [vmem:[#allocation5] sm:$0x3] }
 0x631   :  { %v2153_v20 = vpop.f32.mrf.mxu0  ;;  %v2194_v14 = vpop.f32.mrf.mxu1 }
 0x632   :  { %v3260_v63 = vmul.f32 -1.442695, %v2209_v13  ;;  %v2210_v2 = vadd.f32 %v2202_v60, %v1917_v61  ;;  %v2212_v8 = vadd.f32 %v2204_v4, %v1919_v6  ;;  %v2257_v20 = vld [vmem:[#allocation2 + $0x38] sm:$0x30] }
 0x633   :  { %v2154_v3 = vpop.f32.mrf.mxu0  ;;  %v2195_v27 = vpop.f32.mrf.mxu1 }
 0x634   :  { %3603 = vpow2.f32 %v3260_v63  ;;  %v3261_v62 = vmul.f32 -1.442695, %v2210_v2  ;;  %v3262_v11 = vmul.f32 -1.442695, %v2212_v8  ;;  %v2256_v3 = vld [vmem:[#allocation2 + $0x28] sm:$0x30] }
 0x636   :  { %3605 = vpow2.f32 %v3261_v62 }
 0x637   :  { %3607 = vpow2.f32 %v3262_v11 }
 0x641   :  { %v3604_v15 = vpop.eup %3603 }
 0x642   :  { %v2216_v35 = vadd.f32 1.0, %v3604_v15 }
 0x643   :  { %v3606_v37 = vpop.eup %3605 }
 0x644   :  { %3609 = vrcp.f32 %v2216_v35  ;;  %v2222_v40 = vadd.f32 1.0, %v3606_v37  ;;  %v3608_v48 = vpop.eup %3607 }
 0x645   :  { %3611 = vtanh.f32 %v2211_v16  ;;  %v2229_v53 = vadd.f32 1.0, %v3608_v48 }
 0x646   :  { %3613 = vrcp.f32 %v2222_v40 }
 0x647   :  { %3615 = vrcp.f32 %v2229_v53 }
 0x651   :  { %v3610_v49 = vpop.eup %3609 }
 0x652   :  { %v3612_v50 = vpop.eup %3611 }
 0x653   :  { %v3614_v52 = vpop.eup %3613  ;;  %v2236_v21 = vmul.f32 %v3612_v50, %v3610_v49  ;;  %v2585_v50 = vpop.permute.xlu0 %2584 }
 0x654   :  { %v2235_v54 = vmul.f32 %v3614_v52, %v2233_v51  ;;  %v3616_v24 = vpop.eup %3615  ;;  %vm2586_vm15 = vcmp.eq.s32.totalorder %v2585_v50, 1 }
 0x656   :  { %v2237_v5 = vadd.f32 %v2236_v21, %v2235_v54 }
 0x658   :  { %2240 = vst [vmem:[#allocation4 - $0x2] sm:$0xc] %v2237_v5  ;;  %3617 = vtanh.f32 %v2237_v5 }
 0x65f   :  { %v2259_v10 = vld [vmem:[#allocation4] sm:$0x3] }
 0x660   :  { %v2571_v16 = vrot.slane %v2259_v10, 4 }
 0x665   :  { %v3618_v28 = vpop.eup %3617 }
 0x666   :  { %v2239_v29 = vmul.f32 %v3618_v28, %v3616_v24  ;;  %v2945_v28 = vld [vmem:[#allocation12 + $0x70] sm:$0xff] }
 0x668   :  { %v2250_v32 = vrot.slane %v2239_v29, 2  ;;  %2241 = vst [vmem:[#allocation3 - $0x2] sm:$0xc] %v2239_v29  ;;  %v2944_v29 = vld [vmem:[#allocation12 + $0x68] sm:$0xff] }
 0x66a   :  { %v2252_v9 = vsel %vm2248_vm13, %v2250_v32, %v2243_v7  ;;  %v2943_v32 = vld [vmem:[#allocation12 + $0x60] sm:$0xff]  ;;  %v2942_v7 = vld [vmem:[#allocation12 + $0x58] sm:$0xff] }
 0x66b   :  { %2253 = vst [vmem:[#allocation5] sm:$0x3] %v2252_v9  ;;  %v2941_v9 = vld [vmem:[#allocation12 + $0x50] sm:$0xff] }
 0x66f   :  { %v2258_v13 = vld [vmem:[#allocation3] sm:$0x3] }
 0x670   :  { %v2260_v60 = vpack.c.bf16 %v2258_v13, %v2258_v13  ;;  %v2940_v13 = vld [vmem:[#allocation12 + $0x48] sm:$0xff] }
 0x672   :  { %2486 = vmatmul.mubr.bf16.vlgmr.msra.gmra.mxu0 %v2260_v60  ;;  %2527 = vmatmul.mubr.bf16.vlgmr.msra.gmra.mxu1 %v2260_v60  ;;  %v2581_v21 = vld [vmem:[#allocation5] sm:$0x3]  ;;  %v2939_v60 = vld [vmem:[#allocation12 + $0x40] sm:$0xff] }
 0x673   :  { %2833 = vmatpush1.bf16.msra.mxu1 %v4081_v30  ;;  %2823 = vmatprep.mubr.bf16.mxu0 %v3770_v0  ;;  %v3513_v30 = vld [vmem:[#allocation11 + $0xe4] ss:$16 sps:$4 sm:$0xff]  }
 0x674   :  { %2834 = vmatprep.subr.bf16.mxu1 %v4085_v55  ;;  %2864 = vmatprep.mubr.bf16.mxu1 %v3770_v0  ;;  %v3511_v55 = vld [vmem:[#allocation11 + $0xe0] ss:$16 sps:$4 sm:$0xff]  }
 0x675   :  { %2791 = vmatprep.subr.bf16.mxu0 %v3513_v30  ;;  %v2938_v30 = vld [vmem:[#allocation12 + $0x38] sm:$0xff] }
 0x676   :  { %2792 = vmatpush1.bf16.msra.mxu0 %v3511_v55  ;;  %v2937_v55 = vld [vmem:[#allocation12 + $0x30] sm:$0xff] }
 0x677   :  { %2835 = vmatpush1.bf16.msra.mxu1 %v4087_v56  ;;  %v3516_v56 = vld [vmem:[#allocation11 + $0xc4] ss:$16 sps:$4 sm:$0xff]  }
 0x678   :  { %2836 = vmatprep.subr.bf16.mxu1 %v4097_v18  ;;  %2793 = vmatprep.subr.bf16.mxu0 %v3516_v56  ;;  %v3519_v18 = vld [vmem:[#allocation11 + $0x24] ss:$16 sps:$4 sm:$0xff]   ;;  %v2936_v56 = vld [vmem:[#allocation12 + $0x28] sm:$0xff] }
 0x67b   :  { %2837 = vmatpush1.bf16.msra.mxu1 %v4095_v17  ;;  %v3514_v17 = vld [vmem:[#allocation11 + $0xc0] ss:$16 sps:$4 sm:$0xff]  }
 0x67c   :  { %2838 = vmatprep.subr.bf16.mxu1 %v4102_v22  ;;  %2794 = vmatpush1.bf16.msra.mxu0 %v3514_v17  ;;  %v3517_v22 = vld [vmem:[#allocation11 + $0x20] ss:$16 sps:$4 sm:$0xff]  }
 0x67d   :  { %2795 = vmatprep.subr.bf16.mxu0 %v4093_v57  ;;  %v3520_v57 = vld [vmem:[#allocation11] ss:$16 sps:$4 sm:$0xff]  }
 0x67e   :  { %v2935_v17 = vld [vmem:[#allocation12 + $0x20] sm:$0xff] }
 0x67f   :  { %2839 = vmatpush1.bf16.msra.mxu1 %v4110_v26  ;;  %v3522_v26 = vld [vmem:[#allocation11 + $0x4] ss:$16 sps:$4 sm:$0xff]  }
 0x680   :  { %2840 = vmatprep.subr.bf16.mxu1 %v4115_v36  ;;  %2796 = vmatpush1.bf16.msra.mxu0 %v4091_v31  ;;  %v2920_v31 = vsel %vm2918_vm14, 1, %v3770_v0  ;;  %v2254_v36 = vld [vmem:[#allocation2 + $0x8] sm:$0x30] }
 0x681   :  { %2797 = vmatprep.subr.bf16.mxu0 %v4099_v19  ;;  %2922 = vperm.xlu1 %3401, %v2920_v31  }
 0x683   :  { %2841 = vmatpush1.bf16.msra.mxu1 %v4122_v41 }
 0x684   :  { %2842 = vmatprep.subr.bf16.mxu1 %v4127_v43  ;;  %2798 = vmatpush1.bf16.msra.mxu0 %v4106_v23 }
 0x685   :  { %2799 = vmatprep.subr.bf16.mxu0 %v4112_v33 }
 0x687   :  { %2843 = vmatpush1.bf16.msra.mxu1 %v4134_v45 }
 0x688   :  { %2844 = vmatprep.subr.bf16.mxu1 %v4140_v46  ;;  %2800 = vmatpush1.bf16.msra.mxu0 %v4118_v38 }
 0x689   :  { %2801 = vmatprep.subr.bf16.mxu0 %v4124_v42 }
 0x68b   :  { %2845 = vmatpush1.bf16.msra.mxu1 %v4142_v58 }
 0x68c   :  { %2846 = vmatprep.subr.bf16.mxu1 %v4146_v59  ;;  %2802 = vmatpush1.bf16.msra.mxu0 %v4130_v44  ;;  %v2255_v44 = vld [vmem:[#allocation2 + $0x20] sm:$0x30] }
 0x68d   :  { %2803 = vmatprep.subr.bf16.mxu0 %v3519_v18  ;;  %v2934_v18 = vld [vmem:[#allocation12 + $0x18] sm:$0xff] }
 0x68f   :  { %2847 = vmatpush1.bf16.msra.mxu1 %v4150_v34 }
 0x690   :  { %2804 = vmatpush1.bf16.msra.mxu0 %v3517_v22  ;;  %v2933_v22 = vld [vmem:[#allocation12 + $0x10] sm:$0xff] }
 0x691   :  { %2805 = vmatprep.subr.bf16.mxu0 %v3522_v26  ;;  %v2932_v26 = vld [vmem:[#allocation12 + $0x8] sm:$0xff] }
 0x694   :  { %2806 = vmatpush1.bf16.msra.mxu0 %v3520_v57  ;;  %v2931_v57 = vld [vmem:[#allocation12] sm:$0xff] }
 0x695   :  { %3351 = vmatprep.subr.mxu0 %v3771_v1 }
 0x732   :  { %v2487_v19 = vpop.f32.mrf.mxu0  ;;  %v2528_v23 = vpop.f32.mrf.mxu1 }
 0x733   :  { %v2539_v33 = vrot.slane %v2487_v19, 4  ;;  %v2541_v63 = vrot.slane %v2528_v23, 4 }
 0x734   :  { %v2489_v38 = vpop.f32.mrf.mxu0  ;;  %v2530_v41 = vpop.f32.mrf.mxu1 }
 0x735   :  { %v2547_v42 = vadd.f32 %v2539_v33, %v2254_v36  ;;  %v2540_v43 = vrot.slane %v2489_v38, 4  ;;  %v2542_v0 = vrot.slane %v2530_v41, 4  ;;  %v2549_v62 = vadd.f32 %v2541_v63, %v2256_v3  ;;  %v2592_v33 = vld [vmem:[#allocation2 + $0x8] sm:$0xc0] }
 0x736   :  { %v2491_v45 = vpop.f32.mrf.mxu0  ;;  %v2532_v46 = vpop.f32.mrf.mxu1  ;;  %v2594_v63 = vld [vmem:[#allocation2 + $0x28] sm:$0xc0] }
 0x737   :  { %v3295_v58 = vmul.f32 -1.442695, %v2547_v42  ;;  %v2548_v59 = vadd.f32 %v2540_v43, %v2255_v44  ;;  %v2550_v14 = vadd.f32 %v2542_v0, %v2257_v20  ;;  %v2593_v43 = vld [vmem:[#allocation2 + $0x20] sm:$0xc0] }
 0x738   :  { %v2492_v34 = vpop.f32.mrf.mxu0  ;;  %v2533_v61 = vpop.f32.mrf.mxu1 }
 0x739   :  { %3619 = vpow2.f32 %v3295_v58  ;;  %v3296_v39 = vmul.f32 -1.442695, %v2548_v59  ;;  %v3297_v2 = vmul.f32 -1.442695, %v2550_v14 }
 0x73b   :  { %3621 = vpow2.f32 %v3296_v39  ;;  %v2595_v39 = vld [vmem:[#allocation2 + $0x38] sm:$0xc0] }
 0x73c   :  { %3623 = vpow2.f32 %v3297_v2 }
 0x746   :  { %v3620_v27 = vpop.eup %3619 }
 0x747   :  { %v2554_v4 = vadd.f32 1.0, %v3620_v27 }
 0x748   :  { %v3622_v6 = vpop.eup %3621 }
 0x749   :  { %3625 = vrcp.f32 %v2554_v4  ;;  %v2560_v8 = vadd.f32 1.0, %v3622_v6  ;;  %v3624_v11 = vpop.eup %3623 }
 0x74a   :  { %3627 = vtanh.f32 %v2549_v62  ;;  %v2567_v37 = vadd.f32 1.0, %v3624_v11 }
 0x74b   :  { %3629 = vrcp.f32 %v2560_v8 }
 0x74c   :  { %3631 = vrcp.f32 %v2567_v37 }
 0x756   :  { %v3626_v12 = vpop.eup %3625 }
 0x757   :  { %v3628_v15 = vpop.eup %3627 }
 0x758   :  { %v3630_v35 = vpop.eup %3629  ;;  %v2574_v40 = vmul.f32 %v3628_v15, %v3626_v12 }
 0x759   :  { %v2573_v47 = vmul.f32 %v3630_v35, %v2571_v16  ;;  %v3632_v49 = vpop.eup %3631 }
 0x75b   :  { %v2575_v48 = vadd.f32 %v2574_v40, %v2573_v47 }
 0x75d   :  { %2578 = vst [vmem:[#allocation4 - $0x4] sm:$0x30] %v2575_v48  ;;  %3633 = vtanh.f32 %v2575_v48 }
 0x764   :  { %v2597_v6 = vld [vmem:[#allocation4] sm:$0x3] }
 0x765   :  { %v2909_v12 = vrot.slane %v2597_v6, 2 }
 0x76a   :  { %v3634_v51 = vpop.eup %3633 }
 0x76b   :  { %v2577_v52 = vmul.f32 %v3634_v51, %v3632_v49  ;;  %v2923_v49 = vpop.permute.xlu1 %2922 }
 0x76c   :  { %vm2924_vm1 = vcmp.eq.s32.totalorder %v2923_v49, 1 }
 0x76d   :  { %v2588_v53 = vrot.slane %v2577_v52, 4  ;;  %2579 = vst [vmem:[#allocation3 - $0x4] sm:$0x30] %v2577_v52 }
 0x76f   :  { %v2590_v54 = vsel %vm2586_vm15, %v2588_v53, %v2581_v21 }
 0x770   :  { %2591 = vst [vmem:[#allocation5] sm:$0x3] %v2590_v54  ;;  %v3333_v54 = vld [vmem:[%s4291_s6] ss:$0 sm:$0xff] }
 0x774   :  { %v2596_v5 = vld [vmem:[#allocation3] sm:$0x3] }
 0x775   :  { %v2598_v24 = vpack.c.bf16 %v2596_v5, %v2596_v5 }
 0x777   :  { %2824 = vmatmul.mubr.bf16.vlgmr.msra.gmra.mxu0 %v2598_v24  ;;  %2865 = vmatmul.mubr.bf16.vlgmr.msra.gmra.mxu1 %v2598_v24  ;;  %v2919_v52 = vld [vmem:[#allocation5] sm:$0x3] }
 0x778   :  { %3352 = vmatpush3.msra.mxu0 %v2946_v25  ;;  %3383 = vmatprep.mubr.msk.f32.mxu0 %vm3772_vm0, %v3771_v1 }
 0x779   :  { %3353 = vmatprep.subr.mxu0 %v3771_v1 }
 0x77a   :  { %3354 = vmatpush3.msra.mxu0 %v2945_v28 }
 0x77b   :  { %3355 = vmatprep.subr.mxu0 %v3771_v1 }
 0x77c   :  { %3356 = vmatpush3.msra.mxu0 %v2944_v29 }
 0x77d   :  { %3357 = vmatprep.subr.mxu0 %v3771_v1 }
 0x77e   :  { %3358 = vmatpush3.msra.mxu0 %v2943_v32 }
 0x77f   :  { %3359 = vmatprep.subr.mxu0 %v3771_v1 }
 0x780   :  { %3360 = vmatpush3.msra.mxu0 %v2942_v7 }
 0x781   :  { %3361 = vmatprep.subr.mxu0 %v3771_v1 }
 0x782   :  { %3362 = vmatpush3.msra.mxu0 %v2941_v9 }
 0x783   :  { %3363 = vmatprep.subr.mxu0 %v3771_v1 }
 0x784   :  { %3364 = vmatpush3.msra.mxu0 %v2940_v13 }
 0x785   :  { %3365 = vmatprep.subr.mxu0 %v3771_v1 }
 0x786   :  { %3366 = vmatpush3.msra.mxu0 %v2939_v60 }
 0x787   :  { %3367 = vmatprep.subr.mxu0 %v3771_v1 }
 0x788   :  { %3368 = vmatpush3.msra.mxu0 %v2938_v30 }
 0x789   :  { %3369 = vmatprep.subr.mxu0 %v3771_v1 }
 0x78a   :  { %3370 = vmatpush3.msra.mxu0 %v2937_v55 }
 0x78b   :  { %3371 = vmatprep.subr.mxu0 %v3771_v1 }
 0x78c   :  { %3372 = vmatpush3.msra.mxu0 %v2936_v56 }
 0x78d   :  { %3373 = vmatprep.subr.mxu0 %v3771_v1 }
 0x78e   :  { %3374 = vmatpush3.msra.mxu0 %v2935_v17 }
 0x78f   :  { %3375 = vmatprep.subr.mxu0 %v3771_v1 }
 0x790   :  { %3376 = vmatpush3.msra.mxu0 %v2934_v18 }
 0x791   :  { %3377 = vmatprep.subr.mxu0 %v3771_v1 }
 0x792   :  { %3378 = vmatpush3.msra.mxu0 %v2933_v22 }
 0x793   :  { %3379 = vmatprep.subr.mxu0 %v3771_v1 }
 0x794   :  { %3380 = vmatpush3.msra.mxu0 %v2932_v26 }
 0x795   :  { %3381 = vmatprep.subr.mxu0 %v3771_v1 }
 0x796   :  { %3382 = vmatpush3.msra.mxu0 %v2931_v57 }
 0x837   :  { %v2825_v31 = vpop.f32.mrf.mxu0  ;;  %v2866_v19 = vpop.f32.mrf.mxu1 }
 0x838   :  { %v2877_v23 = vrot.slane %v2825_v31, 2  ;;  %v2879_v20 = vrot.slane %v2866_v19, 2 }
 0x839   :  { %v2827_v36 = vpop.f32.mrf.mxu0  ;;  %v2868_v38 = vpop.f32.mrf.mxu1 }
 0x83a   :  { %v2885_v41 = vadd.f32 %v2877_v23, %v2592_v33  ;;  %v2878_v42 = vrot.slane %v2827_v36, 2  ;;  %v2880_v1 = vrot.slane %v2868_v38, 2  ;;  %v2887_v3 = vadd.f32 %v2879_v20, %v2594_v63 }
 0x83b   :  { %v2829_v44 = vpop.f32.mrf.mxu0  ;;  %v2870_v45 = vpop.f32.mrf.mxu1 }
 0x83c   :  { %v3330_v46 = vmul.f32 -1.442695, %v2885_v41  ;;  %v2886_v58 = vadd.f32 %v2878_v42, %v2593_v43  ;;  %v2888_v0 = vadd.f32 %v2880_v1, %v2595_v39 }
 0x83d   :  { %v2830_v59 = vpop.f32.mrf.mxu0  ;;  %v2871_v34 = vpop.f32.mrf.mxu1 }
 0x83e   :  { %3635 = vpow2.f32 %v3330_v46  ;;  %v3331_v61 = vmul.f32 -1.442695, %v2886_v58  ;;  %v3332_v14 = vmul.f32 -1.442695, %v2888_v0 }
 0x840   :  { %3637 = vpow2.f32 %v3331_v61 }
 0x841   :  { %3639 = vpow2.f32 %v3332_v14 }
 0x84b   :  { %v3636_v2 = vpop.eup %3635 }
 0x84c   :  { %v2892_v27 = vadd.f32 1.0, %v3636_v2 }
 0x84d   :  { %v3638_v62 = vpop.eup %3637 }
 0x84e   :  { %3641 = vrcp.f32 %v2892_v27  ;;  %v2898_v4 = vadd.f32 1.0, %v3638_v62  ;;  %v3640_v8 = vpop.eup %3639 }
 0x84f   :  { %3643 = vtanh.f32 %v2887_v3  ;;  %v2905_v16 = vadd.f32 1.0, %v3640_v8 }
 0x850   :  { %3645 = vrcp.f32 %v2898_v4 }
 0x851   :  { %3647 = vrcp.f32 %v2905_v16 }
 0x85b   :  { %v3642_v10 = vpop.eup %3641 }
 0x85c   :  { %v3644_v11 = vpop.eup %3643 }
 0x85d   :  { %v3646_v15 = vpop.eup %3645  ;;  %v2912_v35 = vmul.f32 %v3644_v11, %v3642_v10 }
 0x85e   :  { %v2911_v37 = vmul.f32 %v3646_v15, %v2909_v12  ;;  %v3648_v47 = vpop.eup %3647 }
 0x860   :  { %v2913_v40 = vadd.f32 %v2912_v35, %v2911_v37 }
 0x862   :  { %2916 = vst [vmem:[#allocation4 - $0x6] sm:$0xc0] %v2913_v40  ;;  %3649 = vtanh.f32 %v2913_v40 }
 0x86f   :  { %v3650_v48 = vpop.eup %3649 }
 0x870   :  { %v2915_v50 = vmul.f32 %v3650_v48, %v3648_v47 }
 0x872   :  { %2917 = vst [vmem:[#allocation3 - $0x6] sm:$0xc0] %v2915_v50  ;;  %v2926_v51 = vrot.slane %v2915_v50, 6 }
 0x874   :  { %v2928_v53 = vsel %vm2924_vm1, %v2926_v51, %v2919_v52 }
 0x875   :  { %2929 = vst [vmem:[#allocation5] sm:$0x3] %v2928_v53 }
 0x87c   :  { %v2930_v21 = vld [vmem:[#allocation5] sm:$0x3] }
 0x87d   :  { %3384 = vmatmul.mubr.f32.vlgmr.msra.gmra.mxu0 %v2930_v21 }
 0x93d   :  { %v3020_v5 = vpop.f32.mrf.mxu0 }
 0x93e   :  { %v3021_v24 = vadd.f32 %v3333_v54, %v3020_v5 }
 0x93f   :  { %v3385_v25 = vpop.f32.mrf.mxu0 }
 0x940   :  { %3024 = vst [vmem:[#allocation14] sm:$0x3] %v3021_v24 }
 0x941   :  { %3743 = shalt.err (!%p3740_p10)
}
 0x942   :  { %3034 = dma.vmem_to_hbm [thread:$0]  %s3032_s30, 32, %s4292_s7, [#allocation8]  }
 0x943   :  { %3758 = dma.done.wait [#allocation8], 32  }
 0x944   :  { %3759 = vsyncadd [#allocation8], 4294967264 }
 0x945   :  { %3038 = vsyncpa [#allocation7], 1 }
 0x946   :  { %3039 = vsyncpa [#allocation10], 1 }
 0x947   :  { %3040 = vsyncpa [#allocation13], 1 }
 0x948   :  { %3041 = vsyncpa [#allocation8], 1 }

</bundles_post_ra>
